<compile_context>
chip_gen: v5e
topology: v5e:2x2
jax: 0.10.0
libtpu: 0.0.40
codegen_flags: <defaults>
</compile_context>

<pallas_src>
import numpy as np
import jax
import jax.numpy as jnp
from jax import lax
from jax.experimental import pallas as pl

# ----------------------------- config (small shapes) -----------------------------
B = 2            # batch
L = 8            # sequence length (== n_max_seq)
BL = B * L       # batch-stacked rows
D_MODEL = 32     # d_model == d_word_vec
N_HEAD = 2
D_K = 16
D_V = 16
D_INNER = 64
D_LABEL = 64     # reduced stand-in for hidden2label's 500
VOCAB = 50
N_MAX_SEQ = L
EPS = 1e-3
TEMPER = float(np.power(D_MODEL, 0.5))
NEG_BIG = -1e30  # finite stand-in for -inf in the key-padding / cross-batch mask
QKV_DIM = 2 * N_HEAD * D_K + N_HEAD * D_V   # fused QKV output width (= 96)

# parameter-slab row layout (packed small vectors, width = D_INNER = 64)
SLAB_ROWS = 16
(ROW_BP, ROW_LN1A, ROW_LN1B, ROW_B1, ROW_B2,
 ROW_LN2A, ROW_LN2B, ROW_CB1, ROW_CB2) = range(9)


# ----------------------------- helpers -----------------------------
def position_encoding_init(n_position, d_pos_vec):
    position_enc = np.array(
        [[pos / np.power(10000, 2 * (j // 2) / d_pos_vec) for j in range(d_pos_vec)]
         if pos != 0 else np.zeros(d_pos_vec)
         for pos in range(n_position)])
    position_enc[1:, 0::2] = np.sin(position_enc[1:, 0::2])
    position_enc[1:, 1::2] = np.cos(position_enc[1:, 1::2])
    return jnp.asarray(position_enc, dtype=jnp.float32)


def _ln_rows(z, a, b):
    # matches LayerNormalization: mean / unbiased std over last dim, eps added to sigma.
    mu = jnp.mean(z, axis=-1, keepdims=True)
    diff = z - mu
    sigma = jnp.sqrt(jnp.sum(diff * diff, axis=-1, keepdims=True) * (1.0 / (D_MODEL - 1)))
    return diff * pl.reciprocal(sigma + EPS, approx=True) * a + b


# ----------------------------- single fused kernel -----------------------------
def _fused_kernel(x_ref, bias_ref, wqkv_ref, wp_ref, w1_ref, w2_ref,
                  w1c_ref, w2c_ref, slab_ref,
                  out_ref, attn_ref, logit_ref):
    x = x_ref[...]                                   # (B*L, D_MODEL), batch-stacked
    bias = bias_ref[...]                             # (B*L, B*L) additive score bias

    # packed small parameters (static slices of one slab)
    bp     = slab_ref[ROW_BP:ROW_BP + 1,     0:D_MODEL]
    ln1_a  = slab_ref[ROW_LN1A:ROW_LN1A + 1, 0:D_MODEL]
    ln1_b  = slab_ref[ROW_LN1B:ROW_LN1B + 1, 0:D_MODEL]
    b1     = slab_ref[ROW_B1:ROW_B1 + 1,     0:D_INNER]
    b2     = slab_ref[ROW_B2:ROW_B2 + 1,     0:D_MODEL]
    ln2_a  = slab_ref[ROW_LN2A:ROW_LN2A + 1, 0:D_MODEL]
    ln2_b  = slab_ref[ROW_LN2B:ROW_LN2B + 1, 0:D_MODEL]
    clf_b1 = slab_ref[ROW_CB1:ROW_CB1 + 1,   0:D_LABEL]
    clf_b2 = slab_ref[ROW_CB2:ROW_CB2 + 1,   0:1]

    # fused Q|K|V projection over the stacked batch: one MXU push
    qkv = jnp.dot(x, wqkv_ref[...], preferred_element_type=jnp.float32)   # (BL, QKV_DIM)
    k_off = N_HEAD * D_K
    v_off = 2 * N_HEAD * D_K

    # multi-head attention with per-head accumulated output projection
    y = jnp.zeros((BL, D_MODEL), jnp.float32)
    for h in range(N_HEAD):                          # static unroll (n_head = 2)
        q = qkv[:, h * D_K:(h + 1) * D_K]            # 1/temper already folded into W_q
        k = qkv[:, k_off + h * D_K:k_off + (h + 1) * D_K]
        v = qkv[:, v_off + h * D_V:v_off + (h + 1) * D_V]
        s = lax.dot_general(q, k, (((1,), (1,)), ((), ())),
                            preferred_element_type=jnp.float32)           # (BL, BL)
        s = s + bias                                  # mask cross-batch + padded keys
        m_max = jnp.max(s, axis=-1, keepdims=True)
        e = jnp.exp(s - m_max)                        # masked entries -> exactly 0
        attn = e * pl.reciprocal(jnp.sum(e, axis=-1, keepdims=True), approx=True)
        attn_ref[h] = attn                            # full block matrix per head
        o = jnp.dot(attn, v, preferred_element_type=jnp.float32)          # (BL, D_V)
        y = y + jnp.dot(o, wp_ref[h * D_V:(h + 1) * D_V, :],
                        preferred_element_type=jnp.float32)

    y = y + bp
    attn_out = _ln_rows(y + x, ln1_a, ln1_b)          # residual + LayerNorm 1

    # position-wise FFN (Conv1d k=1 -> ReLU -> Conv1d k=1), stacked batch
    h1 = jnp.maximum(jnp.dot(attn_out, w1_ref[...],
                             preferred_element_type=jnp.float32) + b1, 0.0)
    y2 = jnp.dot(h1, w2_ref[...], preferred_element_type=jnp.float32) + b2
    enc = _ln_rows(y2 + attn_out, ln2_a, ln2_b)       # residual + LayerNorm 2
    out_ref[...] = enc

    # classifier head: relu(hidden2label(flatten(enc_b))) -> proj, fused in-kernel.
    # flatten over (L, D) is realised as a sum of per-position matmuls to avoid
    # lane-reshaping the (L, D) tile (MXU has huge slack here).
    hs = []
    for b in range(B):
        xb = enc[b * L:(b + 1) * L, :]                # (L, D_MODEL)
        hb = clf_b1                                   # (1, D_LABEL)
        for l in range(L):
            hb = hb + jnp.dot(xb[l:l + 1, :], w1c_ref[l],
                              preferred_element_type=jnp.float32)
        hs.append(jnp.maximum(hb, 0.0))
    hidden = jnp.concatenate(hs, axis=0)              # (B, D_LABEL)
    logit_ref[...] = jnp.dot(hidden, w2c_ref[...],
                             preferred_element_type=jnp.float32) + clf_b2


def encoder_with_head(x_stacked, bias_full, wqkv, wpT, w1T, w2T, clf_w1, clf_w2T, slab):
    """One pallas_call, single invocation (no grid): whole problem lives in VMEM."""
    return pl.pallas_call(
        _fused_kernel,
        out_shape=(
            jax.ShapeDtypeStruct((BL, D_MODEL), jnp.float32),      # enc_out, batch-stacked
            jax.ShapeDtypeStruct((N_HEAD, BL, BL), jnp.float32),   # attention block matrices
            jax.ShapeDtypeStruct((B, 1), jnp.float32),             # logits
        ),
    )(x_stacked, bias_full, wqkv, wpT, w1T, w2T, clf_w1, clf_w2T, slab)


# ----------------------------- parameter construction -----------------------------
def init_params(key):
    ks = jax.random.split(key, 16)

    def xavier(k, shape, fan_in, fan_out):
        std = float(np.sqrt(2.0 / (fan_in + fan_out)))
        return jax.random.normal(k, shape, dtype=jnp.float32) * std

    word_emb = jax.random.normal(ks[0], (VOCAB, D_MODEL), dtype=jnp.float32) * 0.1
    pos_enc = position_encoding_init(N_MAX_SEQ + 1, D_MODEL)

    # per-head projection weights in torch layout, fused once (review: hoist to init).
    w_qs = xavier(ks[1], (N_HEAD, D_MODEL, D_K), D_MODEL, D_K)
    w_ks = xavier(ks[2], (N_HEAD, D_MODEL, D_K), D_MODEL, D_K)
    w_vs = xavier(ks[3], (N_HEAD, D_MODEL, D_V), D_MODEL, D_V)
    inv_temper = 1.0 / TEMPER
    wq = jnp.transpose(w_qs, (1, 0, 2)).reshape(D_MODEL, N_HEAD * D_K) * inv_temper
    wk = jnp.transpose(w_ks, (1, 0, 2)).reshape(D_MODEL, N_HEAD * D_K)
    wv = jnp.transpose(w_vs, (1, 0, 2)).reshape(D_MODEL, N_HEAD * D_V)
    wqkv = jnp.concatenate([wq, wk, wv], axis=-1)        # (D_MODEL, QKV_DIM)
    assert wqkv.shape == (D_MODEL, QKV_DIM)

    wpT = xavier(ks[4], (N_HEAD * D_V, D_MODEL), N_HEAD * D_V, D_MODEL)
    bp = jax.random.normal(ks[5], (D_MODEL,), dtype=jnp.float32) * 0.01
    ln1_a = jnp.ones((D_MODEL,), jnp.float32)
    ln1_b = jnp.zeros((D_MODEL,), jnp.float32)
    w1T = jax.random.normal(ks[6], (D_MODEL, D_INNER), dtype=jnp.float32) * float(1.0 / np.sqrt(D_MODEL))
    b1 = jax.random.normal(ks[7], (D_INNER,), dtype=jnp.float32) * 0.01
    w2T = jax.random.normal(ks[8], (D_INNER, D_MODEL), dtype=jnp.float32) * float(1.0 / np.sqrt(D_INNER))
    b2 = jax.random.normal(ks[9], (D_MODEL,), dtype=jnp.float32) * 0.01
    ln2_a = jnp.ones((D_MODEL,), jnp.float32)
    ln2_b = jnp.zeros((D_MODEL,), jnp.float32)

    d_flat = L * D_MODEL
    # hidden2label weight^T (d_flat, D_LABEL) stored as (L, D_MODEL, D_LABEL):
    # w1c[l, d, :] == W^T[l*D_MODEL + d, :]  (exactly the torch flatten ordering).
    clf_w1 = (jax.random.normal(ks[10], (d_flat, D_LABEL), dtype=jnp.float32)
              * float(1.0 / np.sqrt(d_flat))).reshape(L, D_MODEL, D_LABEL)
    clf_b1 = jax.random.normal(ks[11], (D_LABEL,), dtype=jnp.float32) * 0.01
    clf_w2T = jax.random.normal(ks[12], (D_LABEL, 1), dtype=jnp.float32) * float(1.0 / np.sqrt(D_LABEL))
    clf_b2 = jax.random.normal(ks[13], (1,), dtype=jnp.float32) * 0.01

    # pack the small vectors into one slab (single DMA / single VMEM window)
    slab = jnp.zeros((SLAB_ROWS, D_INNER), jnp.float32)
    slab = slab.at[ROW_BP, :D_MODEL].set(bp)
    slab = slab.at[ROW_LN1A, :D_MODEL].set(ln1_a)
    slab = slab.at[ROW_LN1B, :D_MODEL].set(ln1_b)
    slab = slab.at[ROW_B1, :D_INNER].set(b1)
    slab = slab.at[ROW_B2, :D_MODEL].set(b2)
    slab = slab.at[ROW_LN2A, :D_MODEL].set(ln2_a)
    slab = slab.at[ROW_LN2B, :D_MODEL].set(ln2_b)
    slab = slab.at[ROW_CB1, :D_LABEL].set(clf_b1)
    slab = slab.at[ROW_CB2, 0].set(clf_b2[0])

    return {"word_emb": word_emb, "pos_enc": pos_enc, "wqkv": wqkv, "wpT": wpT,
            "w1T": w1T, "w2T": w2T, "clf_w1": clf_w1, "clf_w2T": clf_w2T, "slab": slab}


# ----------------------------- full forward (one jit, one pallas_call) -----------------------------
@jax.jit
def model_forward(src_seq, params):
    nonpad = src_seq != 0

    # get_pos: cumsum of ones, zeroed at padding
    src_pos = (jnp.cumsum(jnp.ones_like(src_seq), axis=1) * nonpad).astype(jnp.int32)

    # TODO(synk): embedding table gathers stay in plain JAX glue (data-dependent gather).
    enc_x = (jnp.take(params["word_emb"], src_seq, axis=0)
             + jnp.take(params["pos_enc"], src_pos, axis=0))
    x_stacked = enc_x.reshape(BL, D_MODEL)                    # batch-stacked activations

    # additive score bias over the stacked (B*L, B*L) score matrix:
    # 0 for same-batch non-padded keys, -1e30 for padded keys and cross-batch keys.
    key_bias = jnp.where(nonpad, 0.0, NEG_BIG).astype(jnp.float32)        # (B, L)
    same_batch = jnp.eye(B, dtype=bool)
    bias4 = jnp.where(same_batch[:, None, :, None],
                      jnp.broadcast_to(key_bias[None, None, :, :], (B, L, B, L)),
                      jnp.float32(NEG_BIG))
    bias_full = bias4.reshape(BL, BL)

    enc_flat, attn_full, logits = encoder_with_head(
        x_stacked, bias_full, params["wqkv"], params["wpT"], params["w1T"],
        params["w2T"], params["clf_w1"], params["clf_w2T"], params["slab"])

    enc_output = enc_flat.reshape(B, L, D_MODEL)
    # torch attn layout (n_head*B, L, L), head-major: extract the per-batch diagonal blocks
    attn_blocks = jnp.stack(
        [attn_full[:, b * L:(b + 1) * L, b * L:(b + 1) * L] for b in range(B)], axis=1)
    enc_slf_attns = [attn_blocks.reshape(N_HEAD * B, L, L)]   # n_layers = 1 (module default)
    return logits, enc_output, enc_slf_attns


# ----------------------------- main -----------------------------
if __name__ == "__main__":
    key = jax.random.PRNGKey(0)
    pkey, skey = jax.random.split(key)
    params = init_params(pkey)

    # deterministic token ids in [1, VOCAB); one padding token to exercise the mask
    src_seq = jax.random.randint(skey, (B, L), 1, VOCAB, dtype=jnp.int32)
    src_seq = src_seq.at[0, L - 1].set(0)

    logits, enc_output, enc_slf_attns = model_forward(src_seq, params)
    logits = jax.block_until_ready(logits)
    enc_output = jax.block_until_ready(enc_output)
    attn0 = jax.block_until_ready(enc_slf_attns[0])

    assert logits.shape == (B, 1)
    assert enc_output.shape == (B, L, D_MODEL)
    assert attn0.shape == (N_HEAD * B, L, L)
    assert bool(jnp.all(jnp.isfinite(logits)))
    assert bool(jnp.all(jnp.isfinite(enc_output)))
    assert bool(jnp.all(jnp.isfinite(attn0)))
    # softmax rows sum to ~1 (approx reciprocal -> loose tolerance); padded key gets ~0 weight
    row_sums = jnp.sum(attn0, axis=-1)
    assert bool(jnp.all(jnp.abs(row_sums - 1.0) < 1e-2))
    assert bool(jnp.all(attn0[0, :, L - 1] < 1e-6))   # batch 0's padded key is masked
    print("KERNEL_OK")
</pallas_src>

<mosaic_0001>
module attributes {stable_mosaic.version = 11 : i64} {
  func.func @_fused_kernel(%arg0: memref<16x32xf32, #tpu.memory_space<vmem>>, %arg1: memref<16x16xf32, #tpu.memory_space<vmem>>, %arg2: memref<32x96xf32, #tpu.memory_space<vmem>>, %arg3: memref<32x32xf32, #tpu.memory_space<vmem>>, %arg4: memref<32x64xf32, #tpu.memory_space<vmem>>, %arg5: memref<64x32xf32, #tpu.memory_space<vmem>>, %arg6: memref<8x32x64xf32, #tpu.memory_space<vmem>>, %arg7: memref<64x1xf32, #tpu.memory_space<vmem>>, %arg8: memref<16x64xf32, #tpu.memory_space<vmem>>, %arg9: memref<16x32xf32, #tpu.memory_space<vmem>>, %arg10: memref<2x16x16xf32, #tpu.memory_space<vmem>>, %arg11: memref<2x1xf32, #tpu.memory_space<vmem>>) attributes {dimension_semantics = [], scalar_prefetch = 0 : i64, scratch_operands = 0 : i64, tpu.core_type = #tpu.core_type<tc>} {
    %c0 = arith.constant 0 : index
    %c0_0 = arith.constant 0 : index
    %0 = vector.load %arg0[%c0, %c0_0] : memref<16x32xf32, #tpu.memory_space<vmem>>, vector<16x32xf32>
    %c0_1 = arith.constant 0 : index
    %c0_2 = arith.constant 0 : index
    %1 = vector.load %arg1[%c0_1, %c0_2] : memref<16x16xf32, #tpu.memory_space<vmem>>, vector<16x16xf32>
    %c0_3 = arith.constant 0 : index
    %c0_4 = arith.constant 0 : index
    %2 = vector.load %arg8[%c0_3, %c0_4] : memref<16x64xf32, #tpu.memory_space<vmem>>, vector<1x32xf32>
    %c1 = arith.constant 1 : index
    %c0_5 = arith.constant 0 : index
    %3 = vector.load %arg8[%c1, %c0_5] : memref<16x64xf32, #tpu.memory_space<vmem>>, vector<1x32xf32>
    %c2 = arith.constant 2 : index
    %c0_6 = arith.constant 0 : index
    %4 = vector.load %arg8[%c2, %c0_6] : memref<16x64xf32, #tpu.memory_space<vmem>>, vector<1x32xf32>
    %c3 = arith.constant 3 : index
    %c0_7 = arith.constant 0 : index
    %5 = vector.load %arg8[%c3, %c0_7] : memref<16x64xf32, #tpu.memory_space<vmem>>, vector<1x64xf32>
    %c4 = arith.constant 4 : index
    %c0_8 = arith.constant 0 : index
    %6 = vector.load %arg8[%c4, %c0_8] : memref<16x64xf32, #tpu.memory_space<vmem>>, vector<1x32xf32>
    %c5 = arith.constant 5 : index
    %c0_9 = arith.constant 0 : index
    %7 = vector.load %arg8[%c5, %c0_9] : memref<16x64xf32, #tpu.memory_space<vmem>>, vector<1x32xf32>
    %c6 = arith.constant 6 : index
    %c0_10 = arith.constant 0 : index
    %8 = vector.load %arg8[%c6, %c0_10] : memref<16x64xf32, #tpu.memory_space<vmem>>, vector<1x32xf32>
    %c7 = arith.constant 7 : index
    %c0_11 = arith.constant 0 : index
    %9 = vector.load %arg8[%c7, %c0_11] : memref<16x64xf32, #tpu.memory_space<vmem>>, vector<1x64xf32>
    %c8 = arith.constant 8 : index
    %c0_12 = arith.constant 0 : index
    %10 = vector.load %arg8[%c8, %c0_12] : memref<16x64xf32, #tpu.memory_space<vmem>>, vector<1x1xf32>
    %c0_13 = arith.constant 0 : index
    %c0_14 = arith.constant 0 : index
    %11 = vector.load %arg2[%c0_13, %c0_14] : memref<32x96xf32, #tpu.memory_space<vmem>>, vector<32x96xf32>
    %cst = arith.constant dense<0.000000e+00> : vector<16x96xf32>
    %12 = tpu.matmul %0, %11, %cst {dimension_numbers = #tpu.dot_dimension_numbers<[1], [0], [0], [1], [0, 0, 1, 1], [], []>} : vector<16x32xf32>, vector<32x96xf32>, vector<16x96xf32> -> vector<16x96xf32>
    %cst_15 = arith.constant 0.000000e+00 : f32
    %13 = vector.broadcast %cst_15 : f32 to vector<16x32xf32>
    %14 = vector.extract_strided_slice %12 {offsets = [0, 0], sizes = [16, 16], strides = [1, 1]} : vector<16x96xf32> to vector<16x16xf32>
    %15 = vector.extract_strided_slice %12 {offsets = [0, 32], sizes = [16, 16], strides = [1, 1]} : vector<16x96xf32> to vector<16x16xf32>
    %16 = vector.extract_strided_slice %12 {offsets = [0, 64], sizes = [16, 16], strides = [1, 1]} : vector<16x96xf32> to vector<16x16xf32>
    %cst_16 = arith.constant dense<0.000000e+00> : vector<16x16xf32>
    %17 = tpu.matmul %14, %15, %cst_16 {dimension_numbers = #tpu.dot_dimension_numbers<[1], [1], [0], [0], [0, 0, 1, 0], [], []>} : vector<16x16xf32>, vector<16x16xf32>, vector<16x16xf32> -> vector<16x16xf32>
    %18 = arith.addf %17, %1 : vector<16x16xf32>
    %cst_17 = arith.constant dense<0xFF800000> : vector<16xf32>
    %19 = vector.multi_reduction <maximumf>, %18, %cst_17 [1] : vector<16x16xf32> to vector<16xf32>
    %20 = vector.shape_cast %19 : vector<16xf32> to vector<16x1xf32>
    %21 = vector.broadcast %20 : vector<16x1xf32> to vector<16x16xf32>
    %22 = arith.subf %18, %21 : vector<16x16xf32>
    %23 = math.exp %22 : vector<16x16xf32>
    %cst_18 = arith.constant dense<0.000000e+00> : vector<16xf32>
    %24 = vector.multi_reduction <add>, %23, %cst_18 [1] : vector<16x16xf32> to vector<16xf32>
    %25 = vector.shape_cast %24 : vector<16xf32> to vector<16x1xf32>
    %26 = tpu.reciprocal %25 {approx = true} : vector<16x1xf32> -> vector<16x1xf32>
    %27 = vector.broadcast %26 : vector<16x1xf32> to vector<16x16xf32>
    %28 = arith.mulf %23, %27 : vector<16x16xf32>
    %c0_19 = arith.constant 0 : index
    %c0_20 = arith.constant 0 : index
    %c0_21 = arith.constant 0 : index
    %29 = vector.load %arg10[%c0_19, %c0_20, %c0_21] : memref<2x16x16xf32, #tpu.memory_space<vmem>>, vector<1x16x16xf32>
    %30 = vector.shape_cast %29 : vector<1x16x16xf32> to vector<16x16xf32>
    %31 = vector.shape_cast %28 : vector<16x16xf32> to vector<1x16x16xf32>
    tpu.vector_store %arg10[%c0_19, %c0_20, %c0_21], %31 {strides = array<i32>} : memref<2x16x16xf32, #tpu.memory_space<vmem>>, vector<1x16x16xf32>,
    %cst_22 = arith.constant dense<0.000000e+00> : vector<16x16xf32>
    %32 = tpu.matmul %28, %16, %cst_22 {dimension_numbers = #tpu.dot_dimension_numbers<[1], [0], [0], [1], [0, 0, 1, 1], [], []>} : vector<16x16xf32>, vector<16x16xf32>, vector<16x16xf32> -> vector<16x16xf32>
    %c0_23 = arith.constant 0 : index
    %c0_24 = arith.constant 0 : index
    %33 = vector.load %arg3[%c0_23, %c0_24] : memref<32x32xf32, #tpu.memory_space<vmem>>, vector<16x32xf32>
    %cst_25 = arith.constant dense<0.000000e+00> : vector<16x32xf32>
    %34 = tpu.matmul %32, %33, %cst_25 {dimension_numbers = #tpu.dot_dimension_numbers<[1], [0], [0], [1], [0, 0, 1, 1], [], []>} : vector<16x16xf32>, vector<16x32xf32>, vector<16x32xf32> -> vector<16x32xf32>
    %35 = arith.addf %13, %34 : vector<16x32xf32>
    %36 = vector.extract_strided_slice %12 {offsets = [0, 16], sizes = [16, 16], strides = [1, 1]} : vector<16x96xf32> to vector<16x16xf32>
    %37 = vector.extract_strided_slice %12 {offsets = [0, 48], sizes = [16, 16], strides = [1, 1]} : vector<16x96xf32> to vector<16x16xf32>
    %38 = vector.extract_strided_slice %12 {offsets = [0, 80], sizes = [16, 16], strides = [1, 1]} : vector<16x96xf32> to vector<16x16xf32>
    %cst_26 = arith.constant dense<0.000000e+00> : vector<16x16xf32>
    %39 = tpu.matmul %36, %37, %cst_26 {dimension_numbers = #tpu.dot_dimension_numbers<[1], [1], [0], [0], [0, 0, 1, 0], [], []>} : vector<16x16xf32>, vector<16x16xf32>, vector<16x16xf32> -> vector<16x16xf32>
    %40 = arith.addf %39, %1 : vector<16x16xf32>
    %cst_27 = arith.constant dense<0xFF800000> : vector<16xf32>
    %41 = vector.multi_reduction <maximumf>, %40, %cst_27 [1] : vector<16x16xf32> to vector<16xf32>
    %42 = vector.shape_cast %41 : vector<16xf32> to vector<16x1xf32>
    %43 = vector.broadcast %42 : vector<16x1xf32> to vector<16x16xf32>
    %44 = arith.subf %40, %43 : vector<16x16xf32>
    %45 = math.exp %44 : vector<16x16xf32>
    %cst_28 = arith.constant dense<0.000000e+00> : vector<16xf32>
    %46 = vector.multi_reduction <add>, %45, %cst_28 [1] : vector<16x16xf32> to vector<16xf32>
    %47 = vector.shape_cast %46 : vector<16xf32> to vector<16x1xf32>
    %48 = tpu.reciprocal %47 {approx = true} : vector<16x1xf32> -> vector<16x1xf32>
    %49 = vector.broadcast %48 : vector<16x1xf32> to vector<16x16xf32>
    %50 = arith.mulf %45, %49 : vector<16x16xf32>
    %c1_29 = arith.constant 1 : index
    %c0_30 = arith.constant 0 : index
    %c0_31 = arith.constant 0 : index
    %51 = vector.load %arg10[%c1_29, %c0_30, %c0_31] : memref<2x16x16xf32, #tpu.memory_space<vmem>>, vector<1x16x16xf32>
    %52 = vector.shape_cast %51 : vector<1x16x16xf32> to vector<16x16xf32>
    %53 = vector.shape_cast %50 : vector<16x16xf32> to vector<1x16x16xf32>
    tpu.vector_store %arg10[%c1_29, %c0_30, %c0_31], %53 {strides = array<i32>} : memref<2x16x16xf32, #tpu.memory_space<vmem>>, vector<1x16x16xf32>,
    %cst_32 = arith.constant dense<0.000000e+00> : vector<16x16xf32>
    %54 = tpu.matmul %50, %38, %cst_32 {dimension_numbers = #tpu.dot_dimension_numbers<[1], [0], [0], [1], [0, 0, 1, 1], [], []>} : vector<16x16xf32>, vector<16x16xf32>, vector<16x16xf32> -> vector<16x16xf32>
    %c16 = arith.constant 16 : index
    %c0_33 = arith.constant 0 : index
    %55 = vector.load %arg3[%c16, %c0_33] : memref<32x32xf32, #tpu.memory_space<vmem>>, vector<16x32xf32>
    %cst_34 = arith.constant dense<0.000000e+00> : vector<16x32xf32>
    %56 = tpu.matmul %54, %55, %cst_34 {dimension_numbers = #tpu.dot_dimension_numbers<[1], [0], [0], [1], [0, 0, 1, 1], [], []>} : vector<16x16xf32>, vector<16x32xf32>, vector<16x32xf32> -> vector<16x32xf32>
    %57 = arith.addf %35, %56 : vector<16x32xf32>
    %58 = vector.broadcast %2 : vector<1x32xf32> to vector<16x32xf32>
    %59 = arith.addf %57, %58 : vector<16x32xf32>
    %60 = arith.addf %59, %0 : vector<16x32xf32>
    %cst_35 = arith.constant dense<0.000000e+00> : vector<16xf32>
    %61 = vector.multi_reduction <add>, %60, %cst_35 [1] : vector<16x32xf32> to vector<16xf32>
    %62 = vector.shape_cast %61 : vector<16xf32> to vector<16x1xf32>
    %cst_36 = arith.constant 3.200000e+01 : f32
    %63 = vector.broadcast %cst_36 : f32 to vector<16x1xf32>
    %64 = arith.divf %62, %63 : vector<16x1xf32>
    %65 = vector.broadcast %64 : vector<16x1xf32> to vector<16x32xf32>
    %66 = arith.subf %60, %65 : vector<16x32xf32>
    %67 = arith.mulf %66, %66 : vector<16x32xf32>
    %cst_37 = arith.constant dense<0.000000e+00> : vector<16xf32>
    %68 = vector.multi_reduction <add>, %67, %cst_37 [1] : vector<16x32xf32> to vector<16xf32>
    %69 = vector.shape_cast %68 : vector<16xf32> to vector<16x1xf32>
    %cst_38 = arith.constant 0.0322580636 : f32
    %70 = vector.broadcast %cst_38 : f32 to vector<16x1xf32>
    %71 = arith.mulf %69, %70 : vector<16x1xf32>
    %72 = math.sqrt %71 : vector<16x1xf32>
    %cst_39 = arith.constant 1.000000e-03 : f32
    %73 = vector.broadcast %cst_39 : f32 to vector<16x1xf32>
    %74 = arith.addf %72, %73 : vector<16x1xf32>
    %75 = tpu.reciprocal %74 {approx = true} : vector<16x1xf32> -> vector<16x1xf32>
    %76 = vector.broadcast %75 : vector<16x1xf32> to vector<16x32xf32>
    %77 = arith.mulf %66, %76 : vector<16x32xf32>
    %78 = vector.broadcast %3 : vector<1x32xf32> to vector<16x32xf32>
    %79 = arith.mulf %77, %78 : vector<16x32xf32>
    %80 = vector.broadcast %4 : vector<1x32xf32> to vector<16x32xf32>
    %81 = arith.addf %79, %80 : vector<16x32xf32>
    %c0_40 = arith.constant 0 : index
    %c0_41 = arith.constant 0 : index
    %82 = vector.load %arg4[%c0_40, %c0_41] : memref<32x64xf32, #tpu.memory_space<vmem>>, vector<32x64xf32>
    %cst_42 = arith.constant dense<0.000000e+00> : vector<16x64xf32>
    %83 = tpu.matmul %81, %82, %cst_42 {dimension_numbers = #tpu.dot_dimension_numbers<[1], [0], [0], [1], [0, 0, 1, 1], [], []>} : vector<16x32xf32>, vector<32x64xf32>, vector<16x64xf32> -> vector<16x64xf32>
    %84 = vector.broadcast %5 : vector<1x64xf32> to vector<16x64xf32>
    %85 = arith.addf %83, %84 : vector<16x64xf32>
    %cst_43 = arith.constant 0.000000e+00 : f32
    %86 = vector.broadcast %cst_43 : f32 to vector<16x64xf32>
    %87 = arith.maximumf %85, %86 : vector<16x64xf32>
    %c0_44 = arith.constant 0 : index
    %c0_45 = arith.constant 0 : index
    %88 = vector.load %arg5[%c0_44, %c0_45] : memref<64x32xf32, #tpu.memory_space<vmem>>, vector<64x32xf32>
    %cst_46 = arith.constant dense<0.000000e+00> : vector<16x32xf32>
    %89 = tpu.matmul %87, %88, %cst_46 {dimension_numbers = #tpu.dot_dimension_numbers<[1], [0], [0], [1], [0, 0, 1, 1], [], []>} : vector<16x64xf32>, vector<64x32xf32>, vector<16x32xf32> -> vector<16x32xf32>
    %90 = vector.broadcast %6 : vector<1x32xf32> to vector<16x32xf32>
    %91 = arith.addf %89, %90 : vector<16x32xf32>
    %92 = arith.addf %91, %81 : vector<16x32xf32>
    %cst_47 = arith.constant dense<0.000000e+00> : vector<16xf32>
    %93 = vector.multi_reduction <add>, %92, %cst_47 [1] : vector<16x32xf32> to vector<16xf32>
    %94 = vector.shape_cast %93 : vector<16xf32> to vector<16x1xf32>
    %cst_48 = arith.constant 3.200000e+01 : f32
    %95 = vector.broadcast %cst_48 : f32 to vector<16x1xf32>
    %96 = arith.divf %94, %95 : vector<16x1xf32>
    %97 = vector.broadcast %96 : vector<16x1xf32> to vector<16x32xf32>
    %98 = arith.subf %92, %97 : vector<16x32xf32>
    %99 = arith.mulf %98, %98 : vector<16x32xf32>
    %cst_49 = arith.constant dense<0.000000e+00> : vector<16xf32>
    %100 = vector.multi_reduction <add>, %99, %cst_49 [1] : vector<16x32xf32> to vector<16xf32>
    %101 = vector.shape_cast %100 : vector<16xf32> to vector<16x1xf32>
    %cst_50 = arith.constant 0.0322580636 : f32
    %102 = vector.broadcast %cst_50 : f32 to vector<16x1xf32>
    %103 = arith.mulf %101, %102 : vector<16x1xf32>
    %104 = math.sqrt %103 : vector<16x1xf32>
    %cst_51 = arith.constant 1.000000e-03 : f32
    %105 = vector.broadcast %cst_51 : f32 to vector<16x1xf32>
    %106 = arith.addf %104, %105 : vector<16x1xf32>
    %107 = tpu.reciprocal %106 {approx = true} : vector<16x1xf32> -> vector<16x1xf32>
    %108 = vector.broadcast %107 : vector<16x1xf32> to vector<16x32xf32>
    %109 = arith.mulf %98, %108 : vector<16x32xf32>
    %110 = vector.broadcast %7 : vector<1x32xf32> to vector<16x32xf32>
    %111 = arith.mulf %109, %110 : vector<16x32xf32>
    %112 = vector.broadcast %8 : vector<1x32xf32> to vector<16x32xf32>
    %113 = arith.addf %111, %112 : vector<16x32xf32>
    %c0_52 = arith.constant 0 : index
    %c0_53 = arith.constant 0 : index
    %114 = vector.load %arg9[%c0_52, %c0_53] : memref<16x32xf32, #tpu.memory_space<vmem>>, vector<16x32xf32>
    tpu.vector_store %arg9[%c0_52, %c0_53], %113 {strides = array<i32>} : memref<16x32xf32, #tpu.memory_space<vmem>>, vector<16x32xf32>,
    %115 = vector.extract_strided_slice %113 {offsets = [0, 0], sizes = [8, 32], strides = [1, 1]} : vector<16x32xf32> to vector<8x32xf32>
    %116 = vector.extract_strided_slice %115 {offsets = [0, 0], sizes = [1, 32], strides = [1, 1]} : vector<8x32xf32> to vector<1x32xf32>
    %c0_54 = arith.constant 0 : index
    %c0_55 = arith.constant 0 : index
    %c0_56 = arith.constant 0 : index
    %117 = vector.load %arg6[%c0_54, %c0_55, %c0_56] : memref<8x32x64xf32, #tpu.memory_space<vmem>>, vector<1x32x64xf32>
    %118 = vector.shape_cast %117 : vector<1x32x64xf32> to vector<32x64xf32>
    %cst_57 = arith.constant dense<0.000000e+00> : vector<1x64xf32>
    %119 = tpu.matmul %116, %118, %cst_57 {dimension_numbers = #tpu.dot_dimension_numbers<[1], [0], [0], [1], [0, 0, 1, 1], [], []>} : vector<1x32xf32>, vector<32x64xf32>, vector<1x64xf32> -> vector<1x64xf32>
    %120 = arith.addf %9, %119 : vector<1x64xf32>
    %121 = vector.extract_strided_slice %115 {offsets = [1, 0], sizes = [1, 32], strides = [1, 1]} : vector<8x32xf32> to vector<1x32xf32>
    %c1_58 = arith.constant 1 : index
    %c0_59 = arith.constant 0 : index
    %c0_60 = arith.constant 0 : index
    %122 = vector.load %arg6[%c1_58, %c0_59, %c0_60] : memref<8x32x64xf32, #tpu.memory_space<vmem>>, vector<1x32x64xf32>
    %123 = vector.shape_cast %122 : vector<1x32x64xf32> to vector<32x64xf32>
    %cst_61 = arith.constant dense<0.000000e+00> : vector<1x64xf32>
    %124 = tpu.matmul %121, %123, %cst_61 {dimension_numbers = #tpu.dot_dimension_numbers<[1], [0], [0], [1], [0, 0, 1, 1], [], []>} : vector<1x32xf32>, vector<32x64xf32>, vector<1x64xf32> -> vector<1x64xf32>
    %125 = arith.addf %120, %124 : vector<1x64xf32>
    %126 = vector.extract_strided_slice %115 {offsets = [2, 0], sizes = [1, 32], strides = [1, 1]} : vector<8x32xf32> to vector<1x32xf32>
    %c2_62 = arith.constant 2 : index
    %c0_63 = arith.constant 0 : index
    %c0_64 = arith.constant 0 : index
    %127 = vector.load %arg6[%c2_62, %c0_63, %c0_64] : memref<8x32x64xf32, #tpu.memory_space<vmem>>, vector<1x32x64xf32>
    %128 = vector.shape_cast %127 : vector<1x32x64xf32> to vector<32x64xf32>
    %cst_65 = arith.constant dense<0.000000e+00> : vector<1x64xf32>
    %129 = tpu.matmul %126, %128, %cst_65 {dimension_numbers = #tpu.dot_dimension_numbers<[1], [0], [0], [1], [0, 0, 1, 1], [], []>} : vector<1x32xf32>, vector<32x64xf32>, vector<1x64xf32> -> vector<1x64xf32>
    %130 = arith.addf %125, %129 : vector<1x64xf32>
    %131 = vector.extract_strided_slice %115 {offsets = [3, 0], sizes = [1, 32], strides = [1, 1]} : vector<8x32xf32> to vector<1x32xf32>
    %c3_66 = arith.constant 3 : index
    %c0_67 = arith.constant 0 : index
    %c0_68 = arith.constant 0 : index
    %132 = vector.load %arg6[%c3_66, %c0_67, %c0_68] : memref<8x32x64xf32, #tpu.memory_space<vmem>>, vector<1x32x64xf32>
    %133 = vector.shape_cast %132 : vector<1x32x64xf32> to vector<32x64xf32>
    %cst_69 = arith.constant dense<0.000000e+00> : vector<1x64xf32>
    %134 = tpu.matmul %131, %133, %cst_69 {dimension_numbers = #tpu.dot_dimension_numbers<[1], [0], [0], [1], [0, 0, 1, 1], [], []>} : vector<1x32xf32>, vector<32x64xf32>, vector<1x64xf32> -> vector<1x64xf32>
    %135 = arith.addf %130, %134 : vector<1x64xf32>
    %136 = vector.extract_strided_slice %115 {offsets = [4, 0], sizes = [1, 32], strides = [1, 1]} : vector<8x32xf32> to vector<1x32xf32>
    %c4_70 = arith.constant 4 : index
    %c0_71 = arith.constant 0 : index
    %c0_72 = arith.constant 0 : index
    %137 = vector.load %arg6[%c4_70, %c0_71, %c0_72] : memref<8x32x64xf32, #tpu.memory_space<vmem>>, vector<1x32x64xf32>
    %138 = vector.shape_cast %137 : vector<1x32x64xf32> to vector<32x64xf32>
    %cst_73 = arith.constant dense<0.000000e+00> : vector<1x64xf32>
    %139 = tpu.matmul %136, %138, %cst_73 {dimension_numbers = #tpu.dot_dimension_numbers<[1], [0], [0], [1], [0, 0, 1, 1], [], []>} : vector<1x32xf32>, vector<32x64xf32>, vector<1x64xf32> -> vector<1x64xf32>
    %140 = arith.addf %135, %139 : vector<1x64xf32>
    %141 = vector.extract_strided_slice %115 {offsets = [5, 0], sizes = [1, 32], strides = [1, 1]} : vector<8x32xf32> to vector<1x32xf32>
    %c5_74 = arith.constant 5 : index
    %c0_75 = arith.constant 0 : index
    %c0_76 = arith.constant 0 : index
    %142 = vector.load %arg6[%c5_74, %c0_75, %c0_76] : memref<8x32x64xf32, #tpu.memory_space<vmem>>, vector<1x32x64xf32>
    %143 = vector.shape_cast %142 : vector<1x32x64xf32> to vector<32x64xf32>
    %cst_77 = arith.constant dense<0.000000e+00> : vector<1x64xf32>
    %144 = tpu.matmul %141, %143, %cst_77 {dimension_numbers = #tpu.dot_dimension_numbers<[1], [0], [0], [1], [0, 0, 1, 1], [], []>} : vector<1x32xf32>, vector<32x64xf32>, vector<1x64xf32> -> vector<1x64xf32>
    %145 = arith.addf %140, %144 : vector<1x64xf32>
    %146 = vector.extract_strided_slice %115 {offsets = [6, 0], sizes = [1, 32], strides = [1, 1]} : vector<8x32xf32> to vector<1x32xf32>
    %c6_78 = arith.constant 6 : index
    %c0_79 = arith.constant 0 : index
    %c0_80 = arith.constant 0 : index
    %147 = vector.load %arg6[%c6_78, %c0_79, %c0_80] : memref<8x32x64xf32, #tpu.memory_space<vmem>>, vector<1x32x64xf32>
    %148 = vector.shape_cast %147 : vector<1x32x64xf32> to vector<32x64xf32>
    %cst_81 = arith.constant dense<0.000000e+00> : vector<1x64xf32>
    %149 = tpu.matmul %146, %148, %cst_81 {dimension_numbers = #tpu.dot_dimension_numbers<[1], [0], [0], [1], [0, 0, 1, 1], [], []>} : vector<1x32xf32>, vector<32x64xf32>, vector<1x64xf32> -> vector<1x64xf32>
    %150 = arith.addf %145, %149 : vector<1x64xf32>
    %151 = vector.extract_strided_slice %115 {offsets = [7, 0], sizes = [1, 32], strides = [1, 1]} : vector<8x32xf32> to vector<1x32xf32>
    %c7_82 = arith.constant 7 : index
    %c0_83 = arith.constant 0 : index
    %c0_84 = arith.constant 0 : index
    %152 = vector.load %arg6[%c7_82, %c0_83, %c0_84] : memref<8x32x64xf32, #tpu.memory_space<vmem>>, vector<1x32x64xf32>
    %153 = vector.shape_cast %152 : vector<1x32x64xf32> to vector<32x64xf32>
    %cst_85 = arith.constant dense<0.000000e+00> : vector<1x64xf32>
    %154 = tpu.matmul %151, %153, %cst_85 {dimension_numbers = #tpu.dot_dimension_numbers<[1], [0], [0], [1], [0, 0, 1, 1], [], []>} : vector<1x32xf32>, vector<32x64xf32>, vector<1x64xf32> -> vector<1x64xf32>
    %155 = arith.addf %150, %154 : vector<1x64xf32>
    %cst_86 = arith.constant 0.000000e+00 : f32
    %156 = vector.broadcast %cst_86 : f32 to vector<1x64xf32>
    %157 = arith.maximumf %155, %156 : vector<1x64xf32>
    %158 = vector.extract_strided_slice %113 {offsets = [8, 0], sizes = [8, 32], strides = [1, 1]} : vector<16x32xf32> to vector<8x32xf32>
    %159 = vector.extract_strided_slice %158 {offsets = [0, 0], sizes = [1, 32], strides = [1, 1]} : vector<8x32xf32> to vector<1x32xf32>
    %c0_87 = arith.constant 0 : index
    %c0_88 = arith.constant 0 : index
    %c0_89 = arith.constant 0 : index
    %160 = vector.load %arg6[%c0_87, %c0_88, %c0_89] : memref<8x32x64xf32, #tpu.memory_space<vmem>>, vector<1x32x64xf32>
    %161 = vector.shape_cast %160 : vector<1x32x64xf32> to vector<32x64xf32>
    %cst_90 = arith.constant dense<0.000000e+00> : vector<1x64xf32>
    %162 = tpu.matmul %159, %161, %cst_90 {dimension_numbers = #tpu.dot_dimension_numbers<[1], [0], [0], [1], [0, 0, 1, 1], [], []>} : vector<1x32xf32>, vector<32x64xf32>, vector<1x64xf32> -> vector<1x64xf32>
    %163 = arith.addf %9, %162 : vector<1x64xf32>
    %164 = vector.extract_strided_slice %158 {offsets = [1, 0], sizes = [1, 32], strides = [1, 1]} : vector<8x32xf32> to vector<1x32xf32>
    %c1_91 = arith.constant 1 : index
    %c0_92 = arith.constant 0 : index
    %c0_93 = arith.constant 0 : index
    %165 = vector.load %arg6[%c1_91, %c0_92, %c0_93] : memref<8x32x64xf32, #tpu.memory_space<vmem>>, vector<1x32x64xf32>
    %166 = vector.shape_cast %165 : vector<1x32x64xf32> to vector<32x64xf32>
    %cst_94 = arith.constant dense<0.000000e+00> : vector<1x64xf32>
    %167 = tpu.matmul %164, %166, %cst_94 {dimension_numbers = #tpu.dot_dimension_numbers<[1], [0], [0], [1], [0, 0, 1, 1], [], []>} : vector<1x32xf32>, vector<32x64xf32>, vector<1x64xf32> -> vector<1x64xf32>
    %168 = arith.addf %163, %167 : vector<1x64xf32>
    %169 = vector.extract_strided_slice %158 {offsets = [2, 0], sizes = [1, 32], strides = [1, 1]} : vector<8x32xf32> to vector<1x32xf32>
    %c2_95 = arith.constant 2 : index
    %c0_96 = arith.constant 0 : index
    %c0_97 = arith.constant 0 : index
    %170 = vector.load %arg6[%c2_95, %c0_96, %c0_97] : memref<8x32x64xf32, #tpu.memory_space<vmem>>, vector<1x32x64xf32>
    %171 = vector.shape_cast %170 : vector<1x32x64xf32> to vector<32x64xf32>
    %cst_98 = arith.constant dense<0.000000e+00> : vector<1x64xf32>
    %172 = tpu.matmul %169, %171, %cst_98 {dimension_numbers = #tpu.dot_dimension_numbers<[1], [0], [0], [1], [0, 0, 1, 1], [], []>} : vector<1x32xf32>, vector<32x64xf32>, vector<1x64xf32> -> vector<1x64xf32>
    %173 = arith.addf %168, %172 : vector<1x64xf32>
    %174 = vector.extract_strided_slice %158 {offsets = [3, 0], sizes = [1, 32], strides = [1, 1]} : vector<8x32xf32> to vector<1x32xf32>
    %c3_99 = arith.constant 3 : index
    %c0_100 = arith.constant 0 : index
    %c0_101 = arith.constant 0 : index
    %175 = vector.load %arg6[%c3_99, %c0_100, %c0_101] : memref<8x32x64xf32, #tpu.memory_space<vmem>>, vector<1x32x64xf32>
    %176 = vector.shape_cast %175 : vector<1x32x64xf32> to vector<32x64xf32>
    %cst_102 = arith.constant dense<0.000000e+00> : vector<1x64xf32>
    %177 = tpu.matmul %174, %176, %cst_102 {dimension_numbers = #tpu.dot_dimension_numbers<[1], [0], [0], [1], [0, 0, 1, 1], [], []>} : vector<1x32xf32>, vector<32x64xf32>, vector<1x64xf32> -> vector<1x64xf32>
    %178 = arith.addf %173, %177 : vector<1x64xf32>
    %179 = vector.extract_strided_slice %158 {offsets = [4, 0], sizes = [1, 32], strides = [1, 1]} : vector<8x32xf32> to vector<1x32xf32>
    %c4_103 = arith.constant 4 : index
    %c0_104 = arith.constant 0 : index
    %c0_105 = arith.constant 0 : index
    %180 = vector.load %arg6[%c4_103, %c0_104, %c0_105] : memref<8x32x64xf32, #tpu.memory_space<vmem>>, vector<1x32x64xf32>
    %181 = vector.shape_cast %180 : vector<1x32x64xf32> to vector<32x64xf32>
    %cst_106 = arith.constant dense<0.000000e+00> : vector<1x64xf32>
    %182 = tpu.matmul %179, %181, %cst_106 {dimension_numbers = #tpu.dot_dimension_numbers<[1], [0], [0], [1], [0, 0, 1, 1], [], []>} : vector<1x32xf32>, vector<32x64xf32>, vector<1x64xf32> -> vector<1x64xf32>
    %183 = arith.addf %178, %182 : vector<1x64xf32>
    %184 = vector.extract_strided_slice %158 {offsets = [5, 0], sizes = [1, 32], strides = [1, 1]} : vector<8x32xf32> to vector<1x32xf32>
    %c5_107 = arith.constant 5 : index
    %c0_108 = arith.constant 0 : index
    %c0_109 = arith.constant 0 : index
    %185 = vector.load %arg6[%c5_107, %c0_108, %c0_109] : memref<8x32x64xf32, #tpu.memory_space<vmem>>, vector<1x32x64xf32>
    %186 = vector.shape_cast %185 : vector<1x32x64xf32> to vector<32x64xf32>
    %cst_110 = arith.constant dense<0.000000e+00> : vector<1x64xf32>
    %187 = tpu.matmul %184, %186, %cst_110 {dimension_numbers = #tpu.dot_dimension_numbers<[1], [0], [0], [1], [0, 0, 1, 1], [], []>} : vector<1x32xf32>, vector<32x64xf32>, vector<1x64xf32> -> vector<1x64xf32>
    %188 = arith.addf %183, %187 : vector<1x64xf32>
    %189 = vector.extract_strided_slice %158 {offsets = [6, 0], sizes = [1, 32], strides = [1, 1]} : vector<8x32xf32> to vector<1x32xf32>
    %c6_111 = arith.constant 6 : index
    %c0_112 = arith.constant 0 : index
    %c0_113 = arith.constant 0 : index
    %190 = vector.load %arg6[%c6_111, %c0_112, %c0_113] : memref<8x32x64xf32, #tpu.memory_space<vmem>>, vector<1x32x64xf32>
    %191 = vector.shape_cast %190 : vector<1x32x64xf32> to vector<32x64xf32>
    %cst_114 = arith.constant dense<0.000000e+00> : vector<1x64xf32>
    %192 = tpu.matmul %189, %191, %cst_114 {dimension_numbers = #tpu.dot_dimension_numbers<[1], [0], [0], [1], [0, 0, 1, 1], [], []>} : vector<1x32xf32>, vector<32x64xf32>, vector<1x64xf32> -> vector<1x64xf32>
    %193 = arith.addf %188, %192 : vector<1x64xf32>
    %194 = vector.extract_strided_slice %158 {offsets = [7, 0], sizes = [1, 32], strides = [1, 1]} : vector<8x32xf32> to vector<1x32xf32>
    %c7_115 = arith.constant 7 : index
    %c0_116 = arith.constant 0 : index
    %c0_117 = arith.constant 0 : index
    %195 = vector.load %arg6[%c7_115, %c0_116, %c0_117] : memref<8x32x64xf32, #tpu.memory_space<vmem>>, vector<1x32x64xf32>
    %196 = vector.shape_cast %195 : vector<1x32x64xf32> to vector<32x64xf32>
    %cst_118 = arith.constant dense<0.000000e+00> : vector<1x64xf32>
    %197 = tpu.matmul %194, %196, %cst_118 {dimension_numbers = #tpu.dot_dimension_numbers<[1], [0], [0], [1], [0, 0, 1, 1], [], []>} : vector<1x32xf32>, vector<32x64xf32>, vector<1x64xf32> -> vector<1x64xf32>
    %198 = arith.addf %193, %197 : vector<1x64xf32>
    %cst_119 = arith.constant 0.000000e+00 : f32
    %199 = vector.broadcast %cst_119 : f32 to vector<1x64xf32>
    %200 = arith.maximumf %198, %199 : vector<1x64xf32>
    %201 = tpu.concatenate %157, %200 in 0 : vector<1x64xf32>, vector<1x64xf32> -> vector<2x64xf32>
    %c0_120 = arith.constant 0 : index
    %c0_121 = arith.constant 0 : index
    %202 = vector.load %arg7[%c0_120, %c0_121] : memref<64x1xf32, #tpu.memory_space<vmem>>, vector<64x1xf32>
    %cst_122 = arith.constant dense<0.000000e+00> : vector<2x1xf32>
    %203 = tpu.matmul %201, %202, %cst_122 {dimension_numbers = #tpu.dot_dimension_numbers<[1], [0], [0], [1], [0, 0, 1, 1], [], []>} : vector<2x64xf32>, vector<64x1xf32>, vector<2x1xf32> -> vector<2x1xf32>
    %204 = vector.broadcast %10 : vector<1x1xf32> to vector<2x1xf32>
    %205 = arith.addf %203, %204 : vector<2x1xf32>
    %c0_123 = arith.constant 0 : index
    %c0_124 = arith.constant 0 : index
    %206 = vector.load %arg11[%c0_123, %c0_124] : memref<2x1xf32, #tpu.memory_space<vmem>>, vector<2x1xf32>
    tpu.vector_store %arg11[%c0_123, %c0_124], %205 {strides = array<i32>} : memref<2x1xf32, #tpu.memory_space<vmem>>, vector<2x1xf32>,
    return
  }
}

</mosaic_0001>

<bundles_post_ra>
// kernel: model_forward.1
= control target key start
LH: loop header
LB: loop body
LE: loop exit
PB: predicated region body
PF: predicated region fallthrough
CT: control target
= control target key end

     0   :  { %s1700_s0 = inlined_call_operand.vmem [shape: f32[16,32], index: 0, kind: input, shape index: {}]   ;;  %s1701_s1 = inlined_call_operand.vmem [shape: f32[16,16], index: 1, kind: input, shape index: {}]   ;;  %s1702_s2 = inlined_call_operand.vmem [shape: f32[32,96], index: 2, kind: input, shape index: {}]   ;;  %s1703_s3 = inlined_call_operand.vmem [shape: f32[32,32], index: 3, kind: input, shape index: {}]   ;;  %s1704_s4 = inlined_call_operand.vmem [shape: f32[32,64], index: 4, kind: input, shape index: {}]   ;;  %s1705_s5 = inlined_call_operand.vmem [shape: f32[64,32], index: 5, kind: input, shape index: {}]   ;;  %s1706_s6 = inlined_call_operand.vmem [shape: f32[8,32,64], index: 6, kind: input, shape index: {}]   ;;  %s1707_s7 = inlined_call_operand.vmem [shape: f32[64,1], index: 7, kind: input, shape index: {}]   ;;  %s1708_s8 = inlined_call_operand.vmem [shape: f32[16,64], index: 8, kind: input, shape index: {}]   ;;  %s1709_s9 = inlined_call_operand.hbm [shape: f32[16,32], index: 9, kind: output, shape index: {0}]   ;;  %s1710_s10 = inlined_call_operand.vmem [shape: f32[2,16,16], index: 10, kind: output, shape index: {1}]   ;;  %s1711_s11 = inlined_call_operand.vmem [shape: f32[2,1], index: 11, kind: output, shape index: {2}]  }
   0x1   :  { %v52_v0 = vld [vmem:[%s1702_s2 + $0x18] sm:$0xff]  ;;  %v51_v1 = vld [vmem:[%s1702_s2 + $0x10] sm:$0xff]  ;;  %v50_v2 = vld [vmem:[%s1702_s2 + $0x8] sm:$0xff] }
   0x2   :  { %72 = vmatpush.msra.mxu0 %v52_v0  ;;  %v49_v3 = vld [vmem:[%s1702_s2] sm:$0xff] }
   0x4   :  { %73 = vmatpush.msra.mxu0 %v51_v1 }
   0x5   :  { %17 = vsyncpa [#allocation3], 0  ;;  %v1276_v4 = vld [vmem:[%s1700_s0] sm:$0xff]  ;;  %vm53_vm0 = vcmask 261120   ;;  %v1283_v5 = vld [vmem:[%s1700_s0 + $0x8] sm:$0xff]  ;;  %s1192_s2 = smov 112  }
   0x6   :  { %74 = vmatpush.msra.mxu0 %v50_v2  ;;  %s1193_s29 = smov 80   ;;  %s1194_s30 = smov 96   ;;  %vm89_vm1 = vcmask 130048   ;;  %v38_v14 = vld [vmem:[%s1701_s1] sm:$0xff]  ;;  %v39_v18 = vld [vmem:[%s1701_s1 + $0x8] sm:$0xff]  ;;  %vm454_vm7 = vcmask 523264  }
   0x7   :  { %s1195_s15 = smov 64   ;;  %s1196_s1 = smov 48   ;;  %v181_v53 = vld [vmem:[%s1703_s3 + $0x8] sm:$0xff]  ;;  %vm972_vm12 = vcmask 1040384   ;;  %vm1006_vm13 = vcmask 1024  }
   0x8   :  { %75 = vmatpush.msra.mxu0 %v49_v3  ;;  %s1014_s25 = sshll.u32 %s1709_s9, 4  ;;  %s1199_s26 = smov 128   ;;  %s1015_s25 = int_to_ptr.hbm [resolvable:$true] %s1014_s25 }
   0x9   :  { %1034 = vmatmul.msk.f32.vlgmr.msra.gmra.mxu0 %vm53_vm0, %v1276_v4  ;;  %s1200_s27 = smov 8  }
  0x11   :  { %1035 = vmatmul.msk.f32.gmra.mxu0 %vm53_vm0, %v1283_v5 }
  0x86   :  { %v77_v6 = vpop.f32.mrf.mxu0 }
  0x87   :  { %182 = vrot.lane.b32.xlu2 %v77_v6, %s1192_s2 }
  0x8e   :  { %v80_v7 = vpop.f32.mrf.mxu0 }
  0x8f   :  { %184 = vrot.lane.b32.xlu2 %v80_v7, %s1192_s2  ;;  %188 = vrot.lane.b32.xlu1 %v80_v7, %s1193_s29  ;;  %v1114_v28 = vpack.i.bf16 %v77_v6, %v80_v7 }
  0x90   :  { %87 = vrot.lane.b32.xlu0 %v80_v7, %s1194_s30 }
  0x97   :  { %186 = vrot.lane.b32.xlu1 %v77_v6, %s1193_s29 }
  0x98   :  { %85 = vrot.lane.b32.xlu0 %v77_v6, %s1194_s30 }
  0xe1   :  { %v183_v12 = vpop.permute.xlu2 %182 }
  0xe9   :  { %v185_v13 = vpop.permute.xlu2 %184 }
 0x101   :  { %v189_v9 = vpop.permute.xlu1 %188 }
 0x102   :  { %v88_v8 = vpop.permute.xlu0 %87 }
 0x103   :  { %1036 = vmatpush.xpose.msk.msra.mxu1 %vm89_vm1, %v88_v8  ;;  %1103 = vmatpush.xpose.msk.msra.mxu3 %vm89_vm1, %v88_v8  ;;  %v281_v8 = vld [vmem:[%s1703_s3 + $0x10] sm:$0xff] }
 0x109   :  { %v187_v11 = vpop.permute.xlu1 %186 }
 0x10a   :  { %v86_v10 = vpop.permute.xlu0 %85 }
 0x10b   :  { %1037 = vmatpush.xpose.msk.msra.mxu1 %vm89_vm1, %v86_v10  ;;  %1104 = vmatpush.xpose.msk.msra.mxu3 %vm89_vm1, %v86_v10 }
 0x10e   :  { %1038 = vmatmul.msk.f32.vlgmr.msra.gmra.mxu1 %vm89_vm1, %v77_v6  ;;  %1039 = vmatmul.msk.f32.vlgmr.msra.gmra.mxu3 %vm89_vm1, %v80_v7  ;;  %v180_v6 = vld [vmem:[%s1703_s3] sm:$0xff]  ;;  %v282_v7 = vld [vmem:[%s1703_s3 + $0x18] sm:$0xff] }
 0x10f   :  { %1042 = vmatpush.xpose.msk.msrb.mxu3 %vm89_vm1, %v189_v9  ;;  %332 = vmatpush.msrb.mxu1 %v181_v53  ;;  %v452_v53 = vld [vmem:[%s1705_s5 + $0x38] sm:$0xff] }
 0x110   :  { %303 = vmatpush.msrb.mxu0 %v282_v7 }
 0x111   :  { %333 = vmatpush.msrb.mxu1 %v180_v6 }
 0x112   :  { %304 = vmatpush.msrb.mxu0 %v281_v8 }
 0x113   :  { %1043 = vmatpush.xpose.msk.msrb.mxu3 %vm89_vm1, %v187_v11 }
 0x116   :  { %1044 = vmatmul.msk.f32.vlgmr.msrb.gmra.mxu3 %vm89_vm1, %v183_v12 }
 0x11e   :  { %1045 = vmatmul.msk.f32.gmra.mxu3 %vm89_vm1, %v185_v13 }
 0x18b   :  { %v115_v15 = vpop.f32.mrf.mxu1 }
 0x18c   :  { %v116_v16 = vadd.f32 %v115_v15, %v38_v14 }
 0x18e   :  { %v121_v17 = vsel %vm89_vm1, %v116_v16, -inf }
 0x18f   :  { %122 = vmax.xlane.f32.xlu0 %v121_v17 }
 0x191   :  { %v118_v19 = vpop.f32.mrf.mxu3 }
 0x192   :  { %v119_v20 = vadd.f32 %v118_v19, %v39_v18 }
 0x194   :  { %v124_v21 = vsel %vm89_vm1, %v119_v20, -inf }
 0x195   :  { %125 = vmax.xlane.f32.xlu1 %v124_v21 }
 0x199   :  { %v215_v22 = vpop.f32.mrf.mxu3 }
 0x19a   :  { %v216_v23 = vadd.f32 %v215_v22, %v38_v14  ;;  %v1124_v14 = vld [vmem:[%s1708_s8] ss:$0 sm:$0xff] }
 0x19c   :  { %v221_v24 = vsel %vm89_vm1, %v216_v23, -inf }
 0x19d   :  { %222 = vmax.xlane.f32.xlu2 %v221_v24 }
 0x1a1   :  { %v218_v25 = vpop.f32.mrf.mxu3 }
 0x1a2   :  { %v219_v26 = vadd.f32 %v218_v25, %v39_v18 }
 0x1a4   :  { %v224_v27 = vsel %vm89_vm1, %v219_v26, -inf }
 0x1a5   :  { %225 = vmax.xlane.f32.xlu2 %v224_v27 }
 0x1ae   :  { %1115 = vrot.lane.b32.xlu1 %v1114_v28, %s1195_s15 }
 0x202   :  { %v123_v29 = vpop.xlane.xlu0 %122 }
 0x203   :  { %v127_v30 = vsub.f32 %v116_v16, %v123_v29 }
 0x205   :  { %v129_v31 = vmul.f32 1.442695, %v127_v30 }
 0x207   :  { %1132 = vpow2.f32 %v129_v31 }
 0x208   :  { %v126_v32 = vpop.xlane.xlu1 %125 }
 0x209   :  { %v128_v33 = vsub.f32 %v119_v20, %v126_v32 }
 0x20b   :  { %v131_v34 = vmul.f32 1.442695, %v128_v33 }
 0x20d   :  { %v1133_v35 = vpop.eup %1132  ;;  %1134 = vpow2.f32 %v131_v34 }
 0x20e   :  { %v133_v36 = vsel %vm89_vm1, %v1133_v35, 0.0 }
 0x20f   :  { %134 = vadd.xlane.f32.xlu0 %v133_v36 }
 0x210   :  { %v223_v37 = vpop.xlane.xlu2 %222 }
 0x211   :  { %v227_v38 = vsub.f32 %v216_v23, %v223_v37 }
 0x213   :  { %v1135_v39 = vpop.eup %1134  ;;  %v229_v40 = vmul.f32 1.442695, %v227_v38 }
 0x214   :  { %v136_v41 = vsel %vm89_vm1, %v1135_v39, 0.0 }
 0x215   :  { %1136 = vpow2.f32 %v229_v40  ;;  %137 = vadd.xlane.f32.xlu2 %v136_v41  ;;  %v412_v41 = vld [vmem:[%s1704_s4 + $0x18] sm:$0xff] }
 0x216   :  { %432 = vmatpush.msra.mxu3 %v412_v41 }
 0x218   :  { %v226_v42 = vpop.xlane.xlu2 %225 }
 0x219   :  { %v228_v43 = vsub.f32 %v219_v26, %v226_v42  ;;  %v1197_v26 = vmov 32.0   ;;  %v411_v42 = vld [vmem:[%s1704_s4 + $0x10] sm:$0xff] }
 0x21a   :  { %433 = vmatpush.msra.mxu3 %v411_v42 }
 0x21b   :  { %v1137_v44 = vpop.eup %1136  ;;  %v231_v45 = vmul.f32 1.442695, %v228_v43  ;;  %v410_v43 = vld [vmem:[%s1704_s4 + $0x8] sm:$0xff] }
 0x21c   :  { %v233_v46 = vsel %vm89_vm1, %v1137_v44, 0.0  ;;  %434 = vmatpush.msra.mxu3 %v410_v43 }
 0x21d   :  { %1138 = vpow2.f32 %v231_v45  ;;  %234 = vadd.xlane.f32.xlu0 %v233_v46 }
 0x220   :  { %v1116_v47 = vpop.permute.xlu1 %1115 }
 0x221   :  { %v1117_v48 = vunpack.i.l.bf16 %v1116_v47  ;;  %v1118_v50 = vunpack.i.h.bf16 %v1116_v47 }
 0x223   :  { %v1139_v49 = vpop.eup %1138  ;;  %171 = vmatpush.msra.mxu2 %v1117_v48 }
 0x224   :  { %v236_v51 = vsel %vm89_vm1, %v1139_v49, 0.0 }
 0x225   :  { %172 = vmatpush.msra.mxu2 %v1118_v50  ;;  %237 = vadd.xlane.f32.xlu0 %v236_v51 }
 0x22d   :  { %1120 = vrot.lane.b32.xlu2 %v1114_v28, %s1196_s1 }
 0x282   :  { %v135_v52 = vpop.xlane.xlu0 %134 }
 0x283   :  { %1140 = vrcp.f32 %v135_v52 }
 0x288   :  { %v138_v54 = vpop.xlane.xlu2 %137 }
 0x289   :  { %v1141_v55 = vpop.eup %1140  ;;  %1142 = vrcp.f32 %v138_v54  ;;  %v451_v54 = vld [vmem:[%s1705_s5 + $0x30] sm:$0xff] }
 0x28a   :  { %v141_v56 = vmul.f32 %v1141_v55, %v1133_v35 }
 0x28c   :  { %143 = vst.msk [vmem:[%s1710_s10] sm:$0xff] %vm89_vm1, %v141_v56  ;;  %1040 = vmatmul.msk.f32.vlgmr.msra.gmra.mxu2 %vm89_vm1, %v141_v56 }
 0x28f   :  { %v1143_v57 = vpop.eup %1142 }
 0x290   :  { %v1121_v58 = vpop.permute.xlu2 %1120  ;;  %v235_v59 = vpop.xlane.xlu0 %234  ;;  %v142_v60 = vmul.f32 %v1143_v57, %v1135_v39  ;;  %v450_v57 = vld [vmem:[%s1705_s5 + $0x28] sm:$0xff] }
 0x291   :  { %1144 = vrcp.f32 %v235_v59  ;;  %v1122_v61 = vunpack.i.l.bf16 %v1121_v58  ;;  %v1123_v62 = vunpack.i.h.bf16 %v1121_v58 }
 0x292   :  { %144 = vst.msk [vmem:[%s1710_s10 + $0x8] sm:$0xff] %vm89_vm1, %v142_v60 }
 0x293   :  { %272 = vmatpush.msrb.mxu2 %v1122_v61 }
 0x294   :  { %1041 = vmatmul.msk.f32.gmra.mxu2 %vm89_vm1, %v142_v60  ;;  %v449_v60 = vld [vmem:[%s1705_s5 + $0x20] sm:$0xff] }
 0x295   :  { %273 = vmatpush.msrb.mxu2 %v1123_v62 }
 0x297   :  { %v1145_v63 = vpop.eup %1144  ;;  %469 = vmatpush.msra.mxu2 %v452_v53 }
 0x298   :  { %v238_v0 = vpop.xlane.xlu0 %237  ;;  %v241_v1 = vmul.f32 %v1145_v63, %v1137_v44  ;;  %v409_v44 = vld [vmem:[%s1704_s4] sm:$0xff] }
 0x299   :  { %1146 = vrcp.f32 %v238_v0  ;;  %435 = vmatpush.msra.mxu3 %v409_v44  ;;  %470 = vmatpush.msra.mxu2 %v451_v54  ;;  %v448_v0 = vld [vmem:[%s1705_s5 + $0x18] sm:$0xff] }
 0x29a   :  { %1046 = vst.msk [vmem:[%s1710_s10 + $0x10] sm:$0xff] %vm89_vm1, %v241_v1  ;;  %1148 = vrcp.f32 %v1197_v26  ;;  %v445_v26 = vld [vmem:[%s1705_s5] sm:$0xff] }
 0x29b   :  { %471 = vmatpush.msra.mxu2 %v450_v57  ;;  %v1461_v57 = vld [vmem:[%s1706_s6 + $0xd8] sm:$0xff] }
 0x29c   :  { %1048 = vmatmul.msk.f32.vlgmr.msrb.gmra.mxu2 %vm89_vm1, %v241_v1 }
 0x29d   :  { %472 = vmatpush.msra.mxu2 %v449_v60  ;;  %v1066_v60 = vld [vmem:[%s1706_s6 + $0x50] sm:$0xff] }
 0x29f   :  { %v1147_v2 = vpop.eup %1146  ;;  %473 = vmatpush.msra.mxu2 %v448_v0  ;;  %v1065_v0 = vld [vmem:[%s1706_s6 + $0x48] sm:$0xff] }
 0x2a0   :  { %v242_v3 = vmul.f32 %v1147_v2, %v1139_v49  ;;  %v1149_v27 = vpop.eup %1148 }
 0x2a1   :  { %v353_v28 = vmul.f32 32.0, %v1149_v27  ;;  %vm357_vm2 = vweird.f32 %v1149_v27 }
 0x2a2   :  { %1047 = vst.msk [vmem:[%s1710_s10 + $0x18] sm:$0xff] %vm89_vm1, %v242_v3 }
 0x2a3   :  { %v354_v29 = vsub.f32 1.0, %v353_v28 }
 0x2a4   :  { %1049 = vmatmul.msk.f32.gmra.mxu2 %vm89_vm1, %v242_v3 }
 0x2a5   :  { %v355_v30 = vmul.f32 %v1149_v27, %v354_v29 }
 0x2a7   :  { %v356_v31 = vadd.f32 %v1149_v27, %v355_v30 }
 0x30f   :  { %v174_v9 = vpop.f32.mrf.mxu2 }
 0x310   :  { %1052 = vmatmul.msk.f32.vlgmr.msrb.gmra.mxu1 %vm89_vm1, %v174_v9 }
 0x317   :  { %v177_v10 = vpop.f32.mrf.mxu2 }
 0x318   :  { %1053 = vmatmul.msk.f32.gmra.mxu1 %vm89_vm1, %v177_v10 }
 0x31f   :  { %v275_v11 = vpop.f32.mrf.mxu2 }
 0x320   :  { %1050 = vmatmul.msk.f32.vlgmr.msrb.gmra.mxu0 %vm89_vm1, %v275_v11 }
 0x327   :  { %v278_v12 = vpop.f32.mrf.mxu2 }
 0x328   :  { %1051 = vmatmul.msk.f32.gmra.mxu0 %vm89_vm1, %v278_v12  ;;  %v1125_v12 = vld [vmem:[%s1708_s8 + $0x1] ss:$0 sm:$0xff] }
 0x38d   :  { %v335_v13 = vpop.f32.mrf.mxu1 }
 0x395   :  { %v338_v20 = vpop.f32.mrf.mxu1 }
 0x39d   :  { %v306_v15 = vpop.f32.mrf.mxu0 }
 0x39e   :  { %v336_v16 = vadd.f32 %v335_v13, %v306_v15 }
 0x3a0   :  { %v342_v17 = vadd.f32 %v1124_v14, %v336_v16 }
 0x3a2   :  { %v344_v18 = vadd.f32 %v342_v17, %v1276_v4  ;;  %v1354_v4 = vsel %vm357_vm2, %v1149_v27, %v356_v31  ;;  %v1126_v17 = vld [vmem:[%s1708_s8 + $0x2] ss:$0 sm:$0xff]  ;;  %v1127_v27 = vld [vmem:[%s1708_s8 + $0x3] ss:$0 sm:$0xff] }
 0x3a4   :  { %v346_v19 = vsel %vm53_vm0, %v344_v18, 0.0 }
 0x3a5   :  { %347 = vadd.xlane.f32.xlu0 %v346_v19  ;;  %v309_v21 = vpop.f32.mrf.mxu0 }
 0x3a6   :  { %v339_v22 = vadd.f32 %v338_v20, %v309_v21 }
 0x3a8   :  { %v343_v23 = vadd.f32 %v1124_v14, %v339_v22 }
 0x3aa   :  { %v345_v24 = vadd.f32 %v343_v23, %v1283_v5 }
 0x3ac   :  { %v349_v25 = vsel %vm53_vm0, %v345_v24, 0.0 }
 0x3ad   :  { %350 = vadd.xlane.f32.xlu1 %v349_v25  ;;  %v446_v25 = vld [vmem:[%s1705_s5 + $0x8] sm:$0xff] }
 0x418   :  { %v348_v32 = vpop.xlane.xlu0 %347 }
 0x419   :  { %v359_v33 = vmul.f32 %v1354_v4, %v348_v32 }
 0x41b   :  { %v1357_v34 = vsub.f32 %v344_v18, %v359_v33 }
 0x41d   :  { %v363_v5 = vmul.f32 %v1357_v34, %v1357_v34 }
 0x41f   :  { %v365_v35 = vsel %vm53_vm0, %v363_v5, 0.0 }
 0x420   :  { %v351_v36 = vpop.xlane.xlu1 %350  ;;  %366 = vadd.xlane.f32.xlu0 %v365_v35 }
 0x421   :  { %v360_v37 = vmul.f32 %v1354_v4, %v351_v36 }
 0x423   :  { %v1363_v38 = vsub.f32 %v345_v24, %v360_v37  ;;  %v447_v24 = vld [vmem:[%s1705_s5 + $0x10] sm:$0xff] }
 0x424   :  { %474 = vmatpush.msra.mxu2 %v447_v24  ;;  %v1591_v24 = vld [vmem:[%s1706_s6 + $0xa0] sm:$0xff] }
 0x425   :  { %v364_v39 = vmul.f32 %v1363_v38, %v1363_v38 }
 0x426   :  { %475 = vmatpush.msra.mxu2 %v446_v25 }
 0x427   :  { %v368_v40 = vsel %vm53_vm0, %v364_v39, 0.0 }
 0x428   :  { %369 = vadd.xlane.f32.xlu2 %v368_v40  ;;  %476 = vmatpush.msra.mxu2 %v445_v26 }
 0x42a   :  { %737 = vmatpush.msrb.mxu2 %v1461_v57 }
 0x493   :  { %v367_v45 = vpop.xlane.xlu0 %366 }
 0x494   :  { %v371_v46 = vmul.f32 0.032258064, %v367_v45 }
 0x496   :  { %1150 = vrsqrt.f32 %v371_v46  ;;  %vm380_vm3 = vcmp.eq.f32.partialorder %v371_v46, inf  ;;  %v383_v63 = vand.u32 2147483648, %v371_v46  ;;  %vm382_vm4 = vcmp.eq.f32.partialorder %v371_v46, 0.0 }
 0x49b   :  { %v370_v47 = vpop.xlane.xlu2 %369 }
 0x49c   :  { %v1151_v48 = vpop.eup %1150  ;;  %v372_v49 = vmul.f32 0.032258064, %v370_v47 }
 0x49d   :  { %v374_v50 = vmul.f32 %v1151_v48, %v371_v46 }
 0x49e   :  { %1152 = vrsqrt.f32 %v372_v49  ;;  %vm392_vm5 = vcmp.eq.f32.partialorder %v372_v49, inf  ;;  %v395_v10 = vand.u32 2147483648, %v372_v49  ;;  %vm394_vm6 = vcmp.eq.f32.partialorder %v372_v49, 0.0 }
 0x49f   :  { %v375_v51 = vmul.f32 %v1151_v48, %v374_v50 }
 0x4a1   :  { %v376_v52 = vmul.f32 0.5, %v375_v51 }
 0x4a3   :  { %v377_v55 = vsub.f32 1.5, %v376_v52  ;;  %v1439_v52 = vld [vmem:[%s1706_s6 + $0x18] sm:$0xff] }
 0x4a4   :  { %v1153_v56 = vpop.eup %1152  ;;  %563 = vmatpush.msra.mxu0 %v1439_v52 }
 0x4a5   :  { %v378_v58 = vmul.f32 %v1151_v48, %v377_v55  ;;  %v386_v59 = vmul.f32 %v1153_v56, %v372_v49  ;;  %v1450_v55 = vld [vmem:[%s1706_s6 + $0x10] sm:$0xff] }
 0x4a6   :  { %564 = vmatpush.msra.mxu0 %v1450_v55 }
 0x4a7   :  { %v379_v61 = vmul.f32 %v378_v58, %v371_v46  ;;  %v387_v62 = vmul.f32 %v1153_v56, %v386_v59  ;;  %v1469_v58 = vld [vmem:[%s1706_s6 + $0x8] sm:$0xff]  ;;  %v1474_v59 = vld [vmem:[%s1706_s6 + $0x30] sm:$0xff] }
 0x4a8   :  { %565 = vmatpush.msra.mxu0 %v1469_v58 }
 0x4a9   :  { %v381_v1 = vsel %vm380_vm3, %v371_v46, %v379_v61  ;;  %v388_v2 = vmul.f32 0.5, %v387_v62  ;;  %v1483_v61 = vld [vmem:[%s1706_s6 + $0xd0] sm:$0xff]  ;;  %v1490_v62 = vld [vmem:[%s1706_s6] sm:$0xff] }
 0x4aa   :  { %v384_v3 = vsel %vm382_vm4, %v383_v63, %v381_v1  ;;  %738 = vmatpush.msrb.mxu2 %v1483_v61  ;;  %v1495_v63 = vld [vmem:[%s1706_s6 + $0x28] sm:$0xff]  ;;  %566 = vmatpush.msra.mxu0 %v1490_v62 }
 0x4ab   :  { %v397_v6 = vadd.f32 0.001, %v384_v3  ;;  %v389_v7 = vsub.f32 1.5, %v388_v2  ;;  %v1504_v1 = vld [vmem:[%s1706_s6 + $0xc8] sm:$0xff]  ;;  %v1511_v2 = vld [vmem:[%s1706_s6 + $0x20] sm:$0xff] }
 0x4ac   :  { %739 = vmatpush.msrb.mxu2 %v1504_v1  ;;  %v1064_v3 = vld [vmem:[%s1706_s6 + $0x40] sm:$0xff] }
 0x4ad   :  { %1154 = vrcp.f32 %v397_v6  ;;  %v390_v8 = vmul.f32 %v1153_v56, %v389_v7  ;;  %v1455_v56 = vld [vmem:[%s1706_s6 + $0x38] sm:$0xff] }
 0x4ae   :  { %592 = vmatpush.msra.mxu1 %v1455_v56  ;;  %v1519_v6 = vld [vmem:[%s1706_s6 + $0x78] sm:$0xff] }
 0x4af   :  { %v391_v9 = vmul.f32 %v390_v8, %v372_v49  ;;  %650 = vmatpush.msrb.mxu0 %v1519_v6  ;;  %v1525_v8 = vld [vmem:[%s1706_s6 + $0xc0] sm:$0xff] }
 0x4b0   :  { %593 = vmatpush.msra.mxu1 %v1474_v59  ;;  %740 = vmatpush.msrb.mxu2 %v1525_v8 }
 0x4b1   :  { %v393_v11 = vsel %vm392_vm5, %v372_v49, %v391_v9 }
 0x4b2   :  { %v396_v13 = vsel %vm394_vm6, %v395_v10, %v393_v11  ;;  %594 = vmatpush.msra.mxu1 %v1495_v63 }
 0x4b3   :  { %v1155_v14 = vpop.eup %1154  ;;  %v398_v15 = vadd.f32 0.001, %v396_v13  ;;  %v1538_v13 = vld [vmem:[%s1706_s6 + $0x98] sm:$0xff] }
 0x4b4   :  { %v401_v16 = vmul.f32 %v1155_v14, %v1357_v34  ;;  %v1128_v34 = vld [vmem:[%s1708_s8 + $0x4] ss:$0 sm:$0xff]  ;;  %595 = vmatpush.msra.mxu1 %v1511_v2  ;;  %v1543_v14 = vld [vmem:[%s1706_s6 + $0xb8] sm:$0xff] }
 0x4b5   :  { %1156 = vrcp.f32 %v398_v15 }
 0x4b6   :  { %v404_v18 = vmul.f32 %v1125_v12, %v401_v16  ;;  %679 = vmatpush.msrb.mxu1 %v1538_v13  ;;  %v1551_v16 = vld [vmem:[%s1706_s6 + $0x68] sm:$0xff] }
 0x4b8   :  { %v407_v19 = vadd.f32 %v1126_v17, %v404_v18  ;;  %v1561_v18 = vld [vmem:[%s1706_s6 + $0xb0] sm:$0xff] }
 0x4ba   :  { %1054 = vmatmul.msk.f32.vlgmr.msra.gmra.mxu3 %vm53_vm0, %v407_v19 }
 0x4bb   :  { %v1157_v20 = vpop.eup %1156 }
 0x4bc   :  { %v402_v21 = vmul.f32 %v1157_v20, %v1363_v38  ;;  %v1569_v20 = vld [vmem:[%s1706_s6 + $0x60] sm:$0xff] }
 0x4be   :  { %v405_v22 = vmul.f32 %v1125_v12, %v402_v21  ;;  %v1533_v12 = vld [vmem:[%s1706_s6 + $0x70] sm:$0xff]  ;;  %v1574_v21 = vld [vmem:[%s1706_s6 + $0x88] sm:$0xff] }
 0x4bf   :  { %651 = vmatpush.msrb.mxu0 %v1533_v12 }
 0x4c0   :  { %v408_v23 = vadd.f32 %v1126_v17, %v405_v22  ;;  %v1556_v17 = vld [vmem:[%s1706_s6 + $0x90] sm:$0xff]  ;;  %v1579_v22 = vld [vmem:[%s1706_s6 + $0xa8] sm:$0xff] }
 0x4c1   :  { %652 = vmatpush.msrb.mxu0 %v1551_v16  ;;  %680 = vmatpush.msrb.mxu1 %v1556_v17 }
 0x4c2   :  { %1055 = vmatmul.msk.f32.gmra.mxu3 %vm53_vm0, %v408_v23 }
 0x4c3   :  { %653 = vmatpush.msrb.mxu0 %v1569_v20  ;;  %681 = vmatpush.msrb.mxu1 %v1574_v21 }
 0x53d   :  { %v437_v28 = vpop.f32.mrf.mxu3 }
 0x53e   :  { %v438_v29 = vadd.f32 %v1127_v27, %v437_v28 }
 0x540   :  { %v443_v30 = vmax.f32 %v438_v29, 0.0 }
 0x542   :  { %1056 = vmatmul.msk.f32.vlgmr.msra.gmra.mxu2 %vm454_vm7, %v443_v30 }
 0x545   :  { %v440_v31 = vpop.f32.mrf.mxu3 }
 0x546   :  { %v441_v32 = vadd.f32 %v1127_v27, %v440_v31 }
 0x548   :  { %v444_v33 = vmax.f32 %v441_v32, 0.0 }
 0x54a   :  { %1057 = vmatmul.msk.f32.gmra.mxu2 %vm454_vm7, %v444_v33 }
 0x5c5   :  { %v478_v5 = vpop.f32.mrf.mxu2 }
 0x5c6   :  { %v479_v35 = vadd.f32 %v1128_v34, %v478_v5 }
 0x5c8   :  { %v484_v36 = vadd.f32 %v479_v35, %v407_v19 }
 0x5ca   :  { %v486_v37 = vsel %vm53_vm0, %v484_v36, 0.0 }
 0x5cb   :  { %487 = vadd.xlane.f32.xlu0 %v486_v37 }
 0x5cd   :  { %v481_v38 = vpop.f32.mrf.mxu2 }
 0x5ce   :  { %v482_v39 = vadd.f32 %v1128_v34, %v481_v38 }
 0x5d0   :  { %v485_v40 = vadd.f32 %v482_v39, %v408_v23  ;;  %v1586_v23 = vld [vmem:[%s1706_s6 + $0x80] sm:$0xff] }
 0x5d1   :  { %682 = vmatpush.msrb.mxu1 %v1586_v23 }
 0x5d2   :  { %v489_v41 = vsel %vm53_vm0, %v485_v40, 0.0 }
 0x5d3   :  { %490 = vadd.xlane.f32.xlu0 %v489_v41 }
 0x63e   :  { %v488_v42 = vpop.xlane.xlu0 %487 }
 0x63f   :  { %v492_v43 = vmul.f32 %v488_v42, %v1354_v4 }
 0x641   :  { %v1425_v44 = vsub.f32 %v484_v36, %v492_v43 }
 0x643   :  { %v496_v45 = vmul.f32 %v1425_v44, %v1425_v44 }
 0x645   :  { %v498_v46 = vsel %vm53_vm0, %v496_v45, 0.0  ;;  %v1130_v45 = vld [vmem:[%s1708_s8 + $0x6] ss:$0 sm:$0xff] }
 0x646   :  { %499 = vadd.xlane.f32.xlu0 %v498_v46  ;;  %v491_v47 = vpop.xlane.xlu0 %490 }
 0x647   :  { %v493_v48 = vmul.f32 %v491_v47, %v1354_v4  ;;  %v1067_v4 = vld [vmem:[%s1706_s6 + $0x58] sm:$0xff] }
 0x648   :  { %621 = vmatpush.msrb.mxu3 %v1067_v4  ;;  %839 = vmatpush.msra.mxu2 %v1067_v4  ;;  %v1091_v4 = vld [vmem:[%s1706_s6 + $0xf0] sm:$0xff] }
 0x649   :  { %v1431_v49 = vsub.f32 %v485_v40, %v493_v48  ;;  %v1129_v40 = vld [vmem:[%s1708_s8 + $0x5] ss:$0 sm:$0xff] }
 0x64a   :  { %622 = vmatpush.msrb.mxu3 %v1066_v60  ;;  %840 = vmatpush.msra.mxu2 %v1066_v60 }
 0x64b   :  { %v497_v50 = vmul.f32 %v1431_v49, %v1431_v49 }
 0x64c   :  { %623 = vmatpush.msrb.mxu3 %v1065_v0  ;;  %841 = vmatpush.msra.mxu2 %v1065_v0  ;;  %v1090_v0 = vld [vmem:[%s1706_s6 + $0xe8] sm:$0xff] }
 0x64d   :  { %v501_v51 = vsel %vm53_vm0, %v497_v50, 0.0  ;;  %v1092_v50 = vld [vmem:[%s1706_s6 + $0xf8] sm:$0xff] }
 0x64e   :  { %502 = vadd.xlane.f32.xlu0 %v501_v51  ;;  %624 = vmatpush.msrb.mxu3 %v1064_v3 }
 0x64f   :  { %842 = vmatpush.msra.mxu2 %v1064_v3 }
 0x650   :  { %708 = vmatpush.msra.mxu3 %v1543_v14 }
 0x652   :  { %709 = vmatpush.msra.mxu3 %v1561_v18 }
 0x654   :  { %710 = vmatpush.msra.mxu3 %v1579_v22 }
 0x656   :  { %711 = vmatpush.msra.mxu3 %v1591_v24 }
 0x6b9   :  { %v500_v53 = vpop.xlane.xlu0 %499 }
 0x6ba   :  { %v1442_v54 = vmul.f32 0.032258064, %v500_v53 }
 0x6bc   :  { %1158 = vrsqrt.f32 %v1442_v54  ;;  %vm513_vm8 = vcmp.eq.f32.partialorder %v1442_v54, inf  ;;  %v516_v31 = vand.u32 2147483648, %v1442_v54  ;;  %vm515_vm9 = vcmp.eq.f32.partialorder %v1442_v54, 0.0 }
 0x6c1   :  { %v503_v7 = vpop.xlane.xlu0 %502 }
 0x6c2   :  { %v1159_v9 = vpop.eup %1158  ;;  %v505_v10 = vmul.f32 0.032258064, %v503_v7 }
 0x6c3   :  { %v507_v11 = vmul.f32 %v1159_v9, %v1442_v54 }
 0x6c4   :  { %1160 = vrsqrt.f32 %v505_v10  ;;  %vm525_vm10 = vcmp.eq.f32.partialorder %v505_v10, inf  ;;  %v528_v38 = vand.u32 2147483648, %v505_v10  ;;  %vm527_vm11 = vcmp.eq.f32.partialorder %v505_v10, 0.0 }
 0x6c5   :  { %v508_v15 = vmul.f32 %v1159_v9, %v507_v11 }
 0x6c7   :  { %v509_v19 = vmul.f32 0.5, %v508_v15 }
 0x6c9   :  { %v510_v25 = vsub.f32 1.5, %v509_v19  ;;  %v47_v19 = vld [vmem:[%s1708_s8 + $0x7] sm:$0x1] }
 0x6ca   :  { %v1161_v26 = vpop.eup %1160 }
 0x6cb   :  { %v511_v27 = vmul.f32 %v1159_v9, %v510_v25  ;;  %v519_v28 = vmul.f32 %v1161_v26, %v505_v10 }
 0x6cd   :  { %v512_v29 = vmul.f32 %v511_v27, %v1442_v54  ;;  %v520_v30 = vmul.f32 %v1161_v26, %v519_v28 }
 0x6cf   :  { %v514_v32 = vsel %vm513_vm8, %v1442_v54, %v512_v29  ;;  %v521_v33 = vmul.f32 0.5, %v520_v30 }
 0x6d0   :  { %v517_v34 = vsel %vm515_vm9, %v516_v31, %v514_v32 }
 0x6d1   :  { %v530_v5 = vadd.f32 0.001, %v517_v34  ;;  %v522_v35 = vsub.f32 1.5, %v521_v33 }
 0x6d3   :  { %1162 = vrcp.f32 %v530_v5  ;;  %v523_v36 = vmul.f32 %v1161_v26, %v522_v35 }
 0x6d5   :  { %v524_v37 = vmul.f32 %v523_v36, %v505_v10 }
 0x6d7   :  { %v526_v39 = vsel %vm525_vm10, %v505_v10, %v524_v37 }
 0x6d8   :  { %v529_v41 = vsel %vm527_vm11, %v528_v38, %v526_v39 }
 0x6d9   :  { %v1163_v42 = vpop.eup %1162  ;;  %v531_v43 = vadd.f32 0.001, %v529_v41 }
 0x6da   :  { %v534_v46 = vmul.f32 %v1163_v42, %v1425_v44 }
 0x6db   :  { %1164 = vrcp.f32 %v531_v43 }
 0x6dc   :  { %v537_v47 = vmul.f32 %v1129_v40, %v534_v46 }
 0x6de   :  { %v540_v48 = vadd.f32 %v1130_v45, %v537_v47 }
 0x6e0   :  { %542 = vst.msk [vmem:[#allocation2] sm:$0xff] %vm53_vm0, %v540_v48  ;;  %1058 = vmatmul.msk.f32.vlgmr.msra.gmra.mxu0 %vm53_vm0, %v540_v48  ;;  %v577_v51 = vrot.slane %v540_v48, 1  ;;  %v606_v53 = vrot.slane %v540_v48, 2  ;;  %v722_v54 = vrot.slane %v540_v48, 6  ;;  %v635_v9 = vrot.slane %v540_v48, 3 }
 0x6e1   :  { %v1165_v60 = vpop.eup %1164  ;;  %766 = vmatpush.msra.mxu0 %v1092_v50 }
 0x6e2   :  { %v535_v44 = vmul.f32 %v1165_v60, %v1431_v49  ;;  %1063 = vmatmul.msk.f32.vlgmr.msra.gmra.mxu1 %vm53_vm0, %v577_v51  ;;  %1068 = vmatmul.msk.f32.vlgmr.msrb.gmra.mxu3 %vm53_vm0, %v606_v53  ;;  %v1089_v49 = vld [vmem:[%s1706_s6 + $0xe0] sm:$0xff] }
 0x6e3   :  { %1088 = vmatmul.msk.f32.vlgmr.msrb.gmra.mxu2 %vm53_vm0, %v722_v54  ;;  %767 = vmatpush.msra.mxu0 %v1091_v4  ;;  %v1131_v54 = vld [vmem:[%s1708_s8 + $0x8] ss:$0 sm:$0xff] }
 0x6e4   :  { %v538_v3 = vmul.f32 %v1129_v40, %v535_v44  ;;  %791 = vmatpush.msra.mxu1 %v1439_v52  ;;  %815 = vmatpush.msrb.mxu3 %v1455_v56  ;;  %v664_v52 = vrot.slane %v540_v48, 4  ;;  %v693_v56 = vrot.slane %v540_v48, 5 }
 0x6e5   :  { %935 = vmatpush.msrb.mxu2 %v1461_v57  ;;  %768 = vmatpush.msra.mxu0 %v1090_v0 }
 0x6e6   :  { %v541_v7 = vadd.f32 %v1130_v45, %v538_v3  ;;  %792 = vmatpush.msra.mxu1 %v1450_v55  ;;  %816 = vmatpush.msrb.mxu3 %v1474_v59  ;;  %v751_v55 = vrot.slane %v540_v48, 7 }
 0x6e7   :  { %936 = vmatpush.msrb.mxu2 %v1483_v61  ;;  %769 = vmatpush.msra.mxu0 %v1089_v49 }
 0x6e8   :  { %543 = vst.msk [vmem:[#allocation2 + $0x8] sm:$0xff] %vm53_vm0, %v541_v7  ;;  %1073 = vmatmul.msk.f32.vlgmr.msrb.gmra.mxu0 %vm53_vm0, %v635_v9  ;;  %v824_v10 = vrot.slane %v541_v7, 2  ;;  %793 = vmatpush.msra.mxu1 %v1469_v58  ;;  %v800_v57 = vrot.slane %v541_v7, 1  ;;  %v920_v58 = vrot.slane %v541_v7, 6  ;;  %v848_v59 = vrot.slane %v541_v7, 3 }
 0x6e9   :  { %817 = vmatpush.msrb.mxu3 %v1495_v63  ;;  %937 = vmatpush.msrb.mxu2 %v1504_v1  ;;  %v872_v61 = vrot.slane %v541_v7, 4  ;;  %v944_v63 = vrot.slane %v541_v7, 7  ;;  %v981_v1 = vld [vmem:[%s1707_s7 + $0x38] sm:$0xff] }
 0x6ea   :  { %1078 = vmatmul.msk.f32.vlgmr.msrb.gmra.mxu1 %vm53_vm0, %v664_v52  ;;  %1083 = vmatmul.msk.f32.vlgmr.msra.gmra.mxu3 %vm53_vm0, %v693_v56 }
 0x6eb   :  { %1096 = vmatmul.msk.f32.vlgmr.msra.gmra.mxu2 %vm53_vm0, %v824_v10  ;;  %794 = vmatpush.msra.mxu1 %v1490_v62  ;;  %v896_v62 = vrot.slane %v541_v7, 5 }
 0x6ec   :  { %818 = vmatpush.msrb.mxu3 %v1511_v2  ;;  %863 = vmatpush.msrb.mxu0 %v1519_v6  ;;  %v980_v2 = vld [vmem:[%s1707_s7 + $0x30] sm:$0xff] }
 0x6ed   :  { %938 = vmatpush.msrb.mxu2 %v1525_v8  ;;  %887 = vmatpush.msrb.mxu1 %v1538_v13  ;;  %v979_v8 = vld [vmem:[%s1707_s7 + $0x28] sm:$0xff]  ;;  %v977_v13 = vld [vmem:[%s1707_s7 + $0x18] sm:$0xff] }
 0x6ee   :  { %864 = vmatpush.msrb.mxu0 %v1533_v12  ;;  %911 = vmatpush.msra.mxu3 %v1543_v14  ;;  %v978_v12 = vld [vmem:[%s1707_s7 + $0x20] sm:$0xff]  ;;  %v976_v14 = vld [vmem:[%s1707_s7 + $0x10] sm:$0xff] }
 0x6ef   :  { %888 = vmatpush.msrb.mxu1 %v1556_v17  ;;  %v975_v17 = vld [vmem:[%s1707_s7 + $0x8] sm:$0xff] }
 0x6f0   :  { %1093 = vmatmul.msk.f32.vlgmr.msra.gmra.mxu0 %vm53_vm0, %v751_v55  ;;  %912 = vmatpush.msra.mxu3 %v1561_v18  ;;  %v974_v18 = vld [vmem:[%s1707_s7] sm:$0xff]  ;;  %s1198_s7 = smov [#allocation2]  }
 0x6f1   :  { %865 = vmatpush.msrb.mxu0 %v1551_v16  ;;  %889 = vmatpush.msrb.mxu1 %v1574_v21  ;;  %s1012_s22 = sshll.u32 %s1198_s7, 4  ;;  %s1013_s22 = int_to_ptr.vmem [resolvable:$true] %s1012_s22 }
 0x6f2   :  { %1094 = vmatmul.msk.f32.vlgmr.msra.gmra.mxu1 %vm53_vm0, %v541_v7  ;;  %1095 = vmatmul.msk.f32.vlgmr.msrb.gmra.mxu3 %vm53_vm0, %v800_v57  ;;  %1020 = dma.vmem_to_hbm [thread:$0]  %s1013_s22, 256, %s1015_s25, [#allocation3], %s1199_s26, %s1199_s26, %s1200_s27  }
 0x6f3   :  { %1100 = vmatmul.msk.f32.vlgmr.msrb.gmra.mxu2 %vm53_vm0, %v920_v58  ;;  %866 = vmatpush.msrb.mxu0 %v1569_v20 }
 0x6f4   :  { %913 = vmatpush.msra.mxu3 %v1579_v22  ;;  %890 = vmatpush.msrb.mxu1 %v1586_v23 }
 0x6f5   :  { %959 = vmatpush.msra.mxu0 %v1092_v50 }
 0x6f6   :  { %914 = vmatpush.msra.mxu3 %v1591_v24  ;;  %994 = vmatpush.msra.mxu1 %v981_v1 }
 0x6f7   :  { %960 = vmatpush.msra.mxu0 %v1091_v4 }
 0x6f8   :  { %1097 = vmatmul.msk.f32.vlgmr.msrb.gmra.mxu0 %vm53_vm0, %v848_v59  ;;  %995 = vmatpush.msra.mxu1 %v980_v2 }
 0x6f9   :  { %961 = vmatpush.msra.mxu0 %v1090_v0 }
 0x6fa   :  { %1098 = vmatmul.msk.f32.vlgmr.msrb.gmra.mxu1 %vm53_vm0, %v872_v61  ;;  %1099 = vmatmul.msk.f32.vlgmr.msra.gmra.mxu3 %vm53_vm0, %v896_v62 }
 0x6fb   :  { %962 = vmatpush.msra.mxu0 %v1089_v49  ;;  %996 = vmatpush.msra.mxu1 %v979_v8 }
 0x6fd   :  { %997 = vmatpush.msra.mxu1 %v978_v12 }
 0x6ff   :  { %998 = vmatpush.msra.mxu1 %v977_v13 }
 0x700   :  { %1101 = vmatmul.msk.f32.vlgmr.msra.gmra.mxu0 %vm53_vm0, %v944_v63 }
 0x701   :  { %999 = vmatpush.msra.mxu1 %v976_v14 }
 0x703   :  { %1000 = vmatpush.msra.mxu1 %v975_v17 }
 0x705   :  { %1001 = vmatpush.msra.mxu1 %v974_v18 }
 0x75d   :  { %v568_v6 = vpop.f32.mrf.mxu0 }
 0x75e   :  { %v571_v21 = vadd.f32 %v568_v6, %v47_v19 }
 0x75f   :  { %v597_v11 = vpop.f32.mrf.mxu1 }
 0x760   :  { %v600_v25 = vadd.f32 %v597_v11, %v571_v21 }
 0x765   :  { %v626_v15 = vpop.f32.mrf.mxu3  ;;  %v655_v16 = vpop.f32.mrf.mxu0 }
 0x766   :  { %v742_v22 = vpop.f32.mrf.mxu2  ;;  %v629_v26 = vadd.f32 %v626_v15, %v600_v25 }
 0x767   :  { %v684_v20 = vpop.f32.mrf.mxu1 }
 0x768   :  { %v658_v28 = vadd.f32 %v655_v16, %v629_v26 }
 0x76a   :  { %v687_v34 = vadd.f32 %v684_v20, %v658_v28 }
 0x76d   :  { %v713_v23 = vpop.f32.mrf.mxu3  ;;  %v771_v24 = vpop.f32.mrf.mxu0 }
 0x76e   :  { %v844_v30 = vpop.f32.mrf.mxu2  ;;  %v716_v35 = vadd.f32 %v713_v23, %v687_v34 }
 0x76f   :  { %v796_v27 = vpop.f32.mrf.mxu1 }
 0x770   :  { %v799_v29 = vadd.f32 %v796_v27, %v47_v19  ;;  %v745_v40 = vadd.f32 %v742_v22, %v716_v35 }
 0x772   :  { %v774_v46 = vadd.f32 %v771_v24, %v745_v40 }
 0x774   :  { %v775_v50 = vmax.f32 %v774_v46, 0.0 }
 0x775   :  { %v820_v31 = vpop.f32.mrf.mxu3  ;;  %v868_v33 = vpop.f32.mrf.mxu0 }
 0x776   :  { %v823_v32 = vadd.f32 %v820_v31, %v799_v29  ;;  %v940_v42 = vpop.f32.mrf.mxu2 }
 0x777   :  { %v892_v37 = vpop.f32.mrf.mxu1 }
 0x778   :  { %v847_v5 = vadd.f32 %v844_v30, %v823_v32 }
 0x77a   :  { %v871_v36 = vadd.f32 %v868_v33, %v847_v5 }
 0x77c   :  { %v895_v38 = vadd.f32 %v892_v37, %v871_v36 }
 0x77d   :  { %v916_v39 = vpop.f32.mrf.mxu3  ;;  %v964_v45 = vpop.f32.mrf.mxu0 }
 0x77e   :  { %v919_v41 = vadd.f32 %v916_v39, %v895_v38 }
 0x780   :  { %v943_v43 = vadd.f32 %v940_v42, %v919_v41 }
 0x782   :  { %v967_v47 = vadd.f32 %v964_v45, %v943_v43 }
 0x784   :  { %v968_v48 = vmax.f32 %v967_v47, 0.0 }
 0x786   :  { %v970_v51 = vrot.slane %v968_v48, 7 }
 0x788   :  { %v973_v53 = vsel %vm972_vm12, %v775_v50, %v970_v51 }
 0x789   :  { %1102 = vmatmul.msk.f32.vlgmr.msra.gmra.mxu1 %vm454_vm7, %v973_v53 }
 0x806   :  { %v1003_v4 = vpop.f32.mrf.mxu1 }
 0x807   :  { %v1004_v60 = vadd.f32 %v1131_v54, %v1003_v4 }
 0x809   :  { %1007 = vst.msk [vmem:[%s1711_s11] sm:$0x3] %vm1006_vm13, %v1004_v60 }
 0x80a   :  { %1190 = dma.done.wait [#allocation3], 256  }
 0x80b   :  { %1191 = vsyncadd [#allocation3], 4294967040 }
 0x80c   :  { %1033 = vsyncpa [#allocation3], 1 }

</bundles_post_ra>
